<compile_context>
chip_gen: v7x
topology: tpu7x:2x2x1
jax: 0.10.0
libtpu: 0.0.40
codegen_flags: <defaults>
</compile_context>

<pallas_src>
import jax
import jax.numpy as jnp
from jax import lax
from jax.experimental import pallas as pl
from jax.experimental.pallas import tpu as pltpu

B, S, H = 2, 8, 16           # batch, seq_length, hidden_size
D = 2 * H                    # LSTM input width / conv channels
G8 = 8 * H                   # fused gate width (4 gates x 2 directions)
EPS = 1e-5


# ----------------------------- fused kernel -------------------------------- #

def _decoding_kernel(x_ref, g_ref, bt_ref, wihf_ref, wihb_ref, whh_ref, bias_ref,
                     cw0_ref, cw1_ref, cb_ref, h_ref, y_ref):
    f32 = jnp.float32

    # ---- LayerNorm over the whole (S, 2H) slab (normalized_shape=(S, 2H)) ----
    x = x_ref[...].astype(f32)
    mean = jnp.mean(x)
    var = jnp.mean((x - mean) ** 2)
    xn = (x - mean) * lax.rsqrt(var + EPS) * g_ref[...] + bt_ref[...]
    # dropout_1: identity (eval mode)

    # ---- BiLSTM: input projection hoisted out of the recurrence ----
    # wihf/wihb are pre-permuted so their contributions already land in the fused
    # 128-lane gate layout [i_f,i_b | f_f,f_b | g_f,g_b | o_f,o_b] (zeros elsewhere).
    xw_f = jnp.dot(xn, wihf_ref[...], preferred_element_type=f32)   # (S, 8H)
    xw_b = jnp.dot(xn, wihb_ref[...], preferred_element_type=f32)   # (S, 8H)
    whh = whh_ref[...]                                              # (2H, 8H) block-diag
    bias = bias_ref[...]                                            # (1, 8H)

    G = 2 * H
    h = jnp.zeros((1, G), f32)       # stacked hidden state [h_fwd | h_bwd]
    c = jnp.zeros((1, G), f32)       # stacked cell state   [c_fwd | c_bwd]
    rows = []
    for t in range(S):               # static unroll: S is small and fixed
        gates = (xw_f[t:t + 1, :] + xw_b[S - 1 - t:S - t, :] + bias
                 + jnp.dot(h, whh, preferred_element_type=f32))     # (1, 8H)
        i_g = jax.nn.sigmoid(gates[:, 0 * G:1 * G])
        f_g = jax.nn.sigmoid(gates[:, 1 * G:2 * G])
        g_g = jnp.tanh(gates[:, 2 * G:3 * G])
        o_g = jax.nn.sigmoid(gates[:, 3 * G:4 * G])
        c = f_g * c + i_g * g_g
        h = o_g * jnp.tanh(c)
        rows.append(h)               # row t = [h_f(t) | h_b(S-1-t)]

    fwd = jnp.concatenate(rows, axis=0)          # (S, 2H); cols 0:H are h_f in time order
    bwd = jnp.concatenate(rows[::-1], axis=0)    # (S, 2H); cols H:2H are h_b in time order
    h_out = jnp.concatenate([fwd[:, :H], bwd[:, H:]], axis=-1)      # (S, 2H)
    # dropout_2: identity (eval mode)

    # ---- Conv1d(in=2H, out=2H, k=2, stride=1), channels-last matmul form ----
    y = (jnp.dot(h_out[0:S - 1, :], cw0_ref[...], preferred_element_type=f32)
         + jnp.dot(h_out[1:S, :], cw1_ref[...], preferred_element_type=f32)
         + cb_ref[...])

    h_ref[...] = h_out.astype(h_ref.dtype)       # one dense store
    y_ref[...] = y.astype(y_ref.dtype)           # one dense store


# ----------------------------- wrapper -------------------------------------- #

def decoding_layer_forward(x, fp):
    h, y = pl.pallas_call(
        _decoding_kernel,
        out_shape=(jax.ShapeDtypeStruct((B, S, D), jnp.float32),
                   jax.ShapeDtypeStruct((B, S - 1, D), jnp.float32)),
        grid=(B,),
        in_specs=[
            pl.BlockSpec((None, S, D), lambda b: (b, 0, 0)),   # x
            pl.BlockSpec((S, D), lambda b: (0, 0)),            # ln gamma
            pl.BlockSpec((S, D), lambda b: (0, 0)),            # ln beta
            pl.BlockSpec((D, G8), lambda b: (0, 0)),           # wih fwd (expanded lanes)
            pl.BlockSpec((D, G8), lambda b: (0, 0)),           # wih bwd (expanded lanes)
            pl.BlockSpec((D, G8), lambda b: (0, 0)),           # whh block-diagonal
            pl.BlockSpec((1, G8), lambda b: (0, 0)),           # fused bias
            pl.BlockSpec((D, D), lambda b: (0, 0)),            # conv w0
            pl.BlockSpec((D, D), lambda b: (0, 0)),            # conv w1
            pl.BlockSpec((1, D), lambda b: (0, 0)),            # conv bias
        ],
        out_specs=(pl.BlockSpec((None, S, D), lambda b: (b, 0, 0)),
                   pl.BlockSpec((None, S - 1, D), lambda b: (b, 0, 0))),
        compiler_params=pltpu.CompilerParams(dimension_semantics=("parallel",)),
    )(x, fp["ln_gamma"], fp["ln_beta"], fp["wih_f"], fp["wih_b"], fp["whh"],
      fp["bias"], fp["conv_w0"], fp["conv_w1"], fp["conv_b"])
    return h, y


# ----------------------------- weight layout plumbing ----------------------- #

def _expand_gate_cols(w, direction):
    """Map a single direction's PyTorch-order [i|f|g|o] (rows, 4H) gate matrix into the
    fused 8H-lane layout [i_f,i_b | f_f,f_b | g_f,g_b | o_f,o_b], zero elsewhere."""
    Z = jnp.zeros((w.shape[0], H), w.dtype)
    blocks = []
    for g in range(4):
        blk = w[:, g * H:(g + 1) * H]
        blocks.extend([blk, Z] if direction == 0 else [Z, blk])
    return jnp.concatenate(blocks, axis=1)       # (rows, 8H)


def prepare_params(p):
    """One-time layout plumbing (pure JAX, outside the kernel / hot path)."""
    return dict(
        ln_gamma=p["ln_gamma"], ln_beta=p["ln_beta"],
        wih_f=_expand_gate_cols(p["wih_f"], 0),
        wih_b=_expand_gate_cols(p["wih_b"], 1),
        whh=jnp.concatenate([_expand_gate_cols(p["whh_f"], 0),
                             _expand_gate_cols(p["whh_b"], 1)], axis=0),
        bias=_expand_gate_cols(p["b_f"], 0) + _expand_gate_cols(p["b_b"], 1),
        conv_w0=p["conv_w0"], conv_w1=p["conv_w1"], conv_b=p["conv_b"],
    )


# ----------------------------- params / reference --------------------------- #

def init_params(key):
    ks = jax.random.split(key, 12)
    u = lambda k, shape, s: jax.random.uniform(k, shape, jnp.float32, -s, s)
    k_lstm = 1.0 / (H ** 0.5)
    k_conv = 1.0 / ((D * 2) ** 0.5)
    conv_w = u(ks[10], (D, D, 2), k_conv)            # (out_ch, in_ch, k)
    return dict(
        ln_gamma=1.0 + 0.1 * jax.random.normal(ks[0], (S, D), jnp.float32),
        ln_beta=0.1 * jax.random.normal(ks[1], (S, D), jnp.float32),
        wih_f=u(ks[2], (D, 4 * H), k_lstm),          # pre-transposed: x @ W_ih^T
        whh_f=u(ks[3], (H, 4 * H), k_lstm),
        b_f=u(ks[4], (1, 4 * H), k_lstm) + u(ks[5], (1, 4 * H), k_lstm),
        wih_b=u(ks[6], (D, 4 * H), k_lstm),
        whh_b=u(ks[7], (H, 4 * H), k_lstm),
        b_b=u(ks[8], (1, 4 * H), k_lstm) + u(ks[9], (1, 4 * H), k_lstm),
        conv_w0=conv_w[:, :, 0].T,
        conv_w1=conv_w[:, :, 1].T,
        conv_b=u(ks[11], (1, D), k_conv),
    )


def reference_forward(x, p):
    mean = jnp.mean(x, axis=(1, 2), keepdims=True)
    var = jnp.mean((x - mean) ** 2, axis=(1, 2), keepdims=True)
    xn = (x - mean) * lax.rsqrt(var + EPS) * p["ln_gamma"] + p["ln_beta"]

    def make_cell(wih, whh, b):
        def f(carry, x_t):
            hh, cc = carry
            gates = x_t @ wih + hh @ whh + b
            i_g = jax.nn.sigmoid(gates[:, 0:H])
            f_g = jax.nn.sigmoid(gates[:, H:2 * H])
            g_g = jnp.tanh(gates[:, 2 * H:3 * H])
            o_g = jax.nn.sigmoid(gates[:, 3 * H:4 * H])
            cc = f_g * cc + i_g * g_g
            hh = o_g * jnp.tanh(cc)
            return (hh, cc), hh
        return f

    xs = jnp.swapaxes(xn, 0, 1)                       # (S, B, 2H)
    init = (jnp.zeros((B, H), jnp.float32), jnp.zeros((B, H), jnp.float32))
    _, out_f = lax.scan(make_cell(p["wih_f"], p["whh_f"], p["b_f"]), init, xs)
    _, out_b = lax.scan(make_cell(p["wih_b"], p["whh_b"], p["b_b"]), init, xs[::-1])
    out_b = out_b[::-1]
    h = jnp.swapaxes(jnp.concatenate([out_f, out_b], axis=-1), 0, 1)   # (B, S, 2H)
    y = h[:, :-1, :] @ p["conv_w0"] + h[:, 1:, :] @ p["conv_w1"] + p["conv_b"]
    return h, y


# ----------------------------- main ------------------------------------------ #

if __name__ == "__main__":
    key = jax.random.PRNGKey(0)
    k_x, k_p = jax.random.split(key)
    x = jax.random.normal(k_x, (B, S, D), jnp.float32)
    params = init_params(k_p)
    fused_params = prepare_params(params)

    fwd = jax.jit(decoding_layer_forward)
    h_out, y_out = fwd(x, fused_params)
    jax.block_until_ready((h_out, y_out))

    h_ref, y_ref = reference_forward(x, params)
    assert h_out.shape == (B, S, D) and y_out.shape == (B, S - 1, D)
    assert jnp.allclose(h_out, h_ref, rtol=5e-3, atol=5e-3), "LSTM output mismatch"
    assert jnp.allclose(y_out, y_ref, rtol=5e-3, atol=5e-3), "Conv output mismatch"

    print("KERNEL_OK")
</pallas_src>

<mosaic_0001>
module attributes {stable_mosaic.version = 11 : i64} {
  func.func @_decoding_kernel(%arg0: i32, %arg1: memref<1x8x32xf32, #tpu.memory_space<vmem>>, %arg2: memref<8x32xf32, #tpu.memory_space<vmem>>, %arg3: memref<8x32xf32, #tpu.memory_space<vmem>>, %arg4: memref<32x128xf32, #tpu.memory_space<vmem>>, %arg5: memref<32x128xf32, #tpu.memory_space<vmem>>, %arg6: memref<32x128xf32, #tpu.memory_space<vmem>>, %arg7: memref<1x128xf32, #tpu.memory_space<vmem>>, %arg8: memref<32x32xf32, #tpu.memory_space<vmem>>, %arg9: memref<32x32xf32, #tpu.memory_space<vmem>>, %arg10: memref<1x32xf32, #tpu.memory_space<vmem>>, %arg11: memref<1x8x32xf32, #tpu.memory_space<vmem>>, %arg12: memref<1x7x32xf32, #tpu.memory_space<vmem>>) attributes {dimension_semantics = [#tpu.dimension_semantics<parallel>], iteration_bounds = array<i64: 2>, scalar_prefetch = 0 : i64, scratch_operands = 0 : i64, tpu.core_type = #tpu.core_type<tc>, window_params = [{transform_indices = @transform_0, window_bounds = array<i64: 1, 8, 32>}, {pipeline_mode = #tpu.pipeline_mode<synchronous>, transform_indices = @transform_1, window_bounds = array<i64: 8, 32>}, {pipeline_mode = #tpu.pipeline_mode<synchronous>, transform_indices = @transform_2, window_bounds = array<i64: 8, 32>}, {pipeline_mode = #tpu.pipeline_mode<synchronous>, transform_indices = @transform_3, window_bounds = array<i64: 32, 128>}, {pipeline_mode = #tpu.pipeline_mode<synchronous>, transform_indices = @transform_4, window_bounds = array<i64: 32, 128>}, {pipeline_mode = #tpu.pipeline_mode<synchronous>, transform_indices = @transform_5, window_bounds = array<i64: 32, 128>}, {pipeline_mode = #tpu.pipeline_mode<synchronous>, transform_indices = @transform_6, window_bounds = array<i64: 1, 128>}, {pipeline_mode = #tpu.pipeline_mode<synchronous>, transform_indices = @transform_7, window_bounds = array<i64: 32, 32>}, {pipeline_mode = #tpu.pipeline_mode<synchronous>, transform_indices = @transform_8, window_bounds = array<i64: 32, 32>}, {pipeline_mode = #tpu.pipeline_mode<synchronous>, transform_indices = @transform_9, window_bounds = array<i64: 1, 32>}, {transform_indices = @transform_10, window_bounds = array<i64: 1, 8, 32>}, {transform_indices = @transform_11, window_bounds = array<i64: 1, 7, 32>}]} {
    %c0 = arith.constant 0 : index
    %c0_0 = arith.constant 0 : index
    %c0_1 = arith.constant 0 : index
    %0 = vector.load %arg1[%c0, %c0_0, %c0_1] : memref<1x8x32xf32, #tpu.memory_space<vmem>>, vector<1x8x32xf32>
    %1 = vector.shape_cast %0 : vector<1x8x32xf32> to vector<8x32xf32>
    %2 = vector.shape_cast %1 : vector<8x32xf32> to vector<1x8x32xf32>
    %cst = arith.constant dense<0.000000e+00> : vector<1xf32>
    %3 = vector.multi_reduction <add>, %2, %cst [1, 2] : vector<1x8x32xf32> to vector<1xf32>
    %4 = vector.shape_cast %3 : vector<1xf32> to vector<1x1x1xf32>
    %5 = vector.extract %4[0, 0, 0] : f32 from vector<1x1x1xf32>
    %cst_2 = arith.constant 2.560000e+02 : f32
    %6 = arith.divf %5, %cst_2 : f32
    %7 = vector.broadcast %6 : f32 to vector<8x32xf32>
    %8 = arith.subf %1, %7 : vector<8x32xf32>
    %9 = arith.mulf %8, %8 : vector<8x32xf32>
    %10 = vector.shape_cast %9 : vector<8x32xf32> to vector<1x8x32xf32>
    %cst_3 = arith.constant dense<0.000000e+00> : vector<1xf32>
    %11 = vector.multi_reduction <add>, %10, %cst_3 [1, 2] : vector<1x8x32xf32> to vector<1xf32>
    %12 = vector.shape_cast %11 : vector<1xf32> to vector<1x1x1xf32>
    %13 = vector.extract %12[0, 0, 0] : f32 from vector<1x1x1xf32>
    %cst_4 = arith.constant 2.560000e+02 : f32
    %14 = arith.divf %13, %cst_4 : f32
    %15 = vector.broadcast %6 : f32 to vector<8x32xf32>
    %16 = arith.subf %1, %15 : vector<8x32xf32>
    %cst_5 = arith.constant 9.99999974E-6 : f32
    %17 = arith.addf %14, %cst_5 : f32
    %18 = math.rsqrt %17 : f32
    %19 = vector.broadcast %18 : f32 to vector<8x32xf32>
    %20 = arith.mulf %16, %19 : vector<8x32xf32>
    %c0_6 = arith.constant 0 : index
    %c0_7 = arith.constant 0 : index
    %21 = vector.load %arg2[%c0_6, %c0_7] : memref<8x32xf32, #tpu.memory_space<vmem>>, vector<8x32xf32>
    %22 = arith.mulf %20, %21 : vector<8x32xf32>
    %c0_8 = arith.constant 0 : index
    %c0_9 = arith.constant 0 : index
    %23 = vector.load %arg3[%c0_8, %c0_9] : memref<8x32xf32, #tpu.memory_space<vmem>>, vector<8x32xf32>
    %24 = arith.addf %22, %23 : vector<8x32xf32>
    %c0_10 = arith.constant 0 : index
    %c0_11 = arith.constant 0 : index
    %25 = vector.load %arg4[%c0_10, %c0_11] : memref<32x128xf32, #tpu.memory_space<vmem>>, vector<32x128xf32>
    %cst_12 = arith.constant dense<0.000000e+00> : vector<8x128xf32>
    %26 = tpu.matmul %24, %25, %cst_12 {dimension_numbers = #tpu.dot_dimension_numbers<[1], [0], [0], [1], [0, 0, 1, 1], [], []>} : vector<8x32xf32>, vector<32x128xf32>, vector<8x128xf32> -> vector<8x128xf32>
    %c0_13 = arith.constant 0 : index
    %c0_14 = arith.constant 0 : index
    %27 = vector.load %arg5[%c0_13, %c0_14] : memref<32x128xf32, #tpu.memory_space<vmem>>, vector<32x128xf32>
    %cst_15 = arith.constant dense<0.000000e+00> : vector<8x128xf32>
    %28 = tpu.matmul %24, %27, %cst_15 {dimension_numbers = #tpu.dot_dimension_numbers<[1], [0], [0], [1], [0, 0, 1, 1], [], []>} : vector<8x32xf32>, vector<32x128xf32>, vector<8x128xf32> -> vector<8x128xf32>
    %c0_16 = arith.constant 0 : index
    %c0_17 = arith.constant 0 : index
    %29 = vector.load %arg6[%c0_16, %c0_17] : memref<32x128xf32, #tpu.memory_space<vmem>>, vector<32x128xf32>
    %c0_18 = arith.constant 0 : index
    %c0_19 = arith.constant 0 : index
    %30 = vector.load %arg7[%c0_18, %c0_19] : memref<1x128xf32, #tpu.memory_space<vmem>>, vector<1x128xf32>
    %cst_20 = arith.constant 0.000000e+00 : f32
    %31 = vector.broadcast %cst_20 : f32 to vector<1x32xf32>
    %cst_21 = arith.constant 0.000000e+00 : f32
    %32 = vector.broadcast %cst_21 : f32 to vector<1x32xf32>
    %33 = vector.extract_strided_slice %26 {offsets = [0, 0], sizes = [1, 128], strides = [1, 1]} : vector<8x128xf32> to vector<1x128xf32>
    %34 = vector.extract_strided_slice %28 {offsets = [7, 0], sizes = [1, 128], strides = [1, 1]} : vector<8x128xf32> to vector<1x128xf32>
    %35 = arith.addf %33, %34 : vector<1x128xf32>
    %36 = arith.addf %35, %30 : vector<1x128xf32>
    %cst_22 = arith.constant dense<0.000000e+00> : vector<1x128xf32>
    %37 = tpu.matmul %31, %29, %cst_22 {dimension_numbers = #tpu.dot_dimension_numbers<[1], [0], [0], [1], [0, 0, 1, 1], [], []>} : vector<1x32xf32>, vector<32x128xf32>, vector<1x128xf32> -> vector<1x128xf32>
    %38 = arith.addf %36, %37 : vector<1x128xf32>
    %39 = vector.extract_strided_slice %38 {offsets = [0, 0], sizes = [1, 32], strides = [1, 1]} : vector<1x128xf32> to vector<1x32xf32>
    %40 = arith.negf %39 : vector<1x32xf32>
    %41 = math.exp %40 : vector<1x32xf32>
    %cst_23 = arith.constant 1.000000e+00 : f32
    %42 = vector.broadcast %cst_23 : f32 to vector<1x32xf32>
    %43 = arith.addf %42, %41 : vector<1x32xf32>
    %44 = arith.divf %42, %43 : vector<1x32xf32>
    %45 = vector.extract_strided_slice %38 {offsets = [0, 32], sizes = [1, 32], strides = [1, 1]} : vector<1x128xf32> to vector<1x32xf32>
    %46 = arith.negf %45 : vector<1x32xf32>
    %47 = math.exp %46 : vector<1x32xf32>
    %cst_24 = arith.constant 1.000000e+00 : f32
    %48 = vector.broadcast %cst_24 : f32 to vector<1x32xf32>
    %49 = arith.addf %48, %47 : vector<1x32xf32>
    %50 = arith.divf %48, %49 : vector<1x32xf32>
    %51 = vector.extract_strided_slice %38 {offsets = [0, 64], sizes = [1, 32], strides = [1, 1]} : vector<1x128xf32> to vector<1x32xf32>
    %52 = math.tanh %51 : vector<1x32xf32>
    %53 = vector.extract_strided_slice %38 {offsets = [0, 96], sizes = [1, 32], strides = [1, 1]} : vector<1x128xf32> to vector<1x32xf32>
    %54 = arith.negf %53 : vector<1x32xf32>
    %55 = math.exp %54 : vector<1x32xf32>
    %cst_25 = arith.constant 1.000000e+00 : f32
    %56 = vector.broadcast %cst_25 : f32 to vector<1x32xf32>
    %57 = arith.addf %56, %55 : vector<1x32xf32>
    %58 = arith.divf %56, %57 : vector<1x32xf32>
    %59 = arith.mulf %50, %32 : vector<1x32xf32>
    %60 = arith.mulf %44, %52 : vector<1x32xf32>
    %61 = arith.addf %59, %60 : vector<1x32xf32>
    %62 = math.tanh %61 : vector<1x32xf32>
    %63 = arith.mulf %58, %62 : vector<1x32xf32>
    %64 = vector.extract_strided_slice %26 {offsets = [1, 0], sizes = [1, 128], strides = [1, 1]} : vector<8x128xf32> to vector<1x128xf32>
    %65 = vector.extract_strided_slice %28 {offsets = [6, 0], sizes = [1, 128], strides = [1, 1]} : vector<8x128xf32> to vector<1x128xf32>
    %66 = arith.addf %64, %65 : vector<1x128xf32>
    %67 = arith.addf %66, %30 : vector<1x128xf32>
    %cst_26 = arith.constant dense<0.000000e+00> : vector<1x128xf32>
    %68 = tpu.matmul %63, %29, %cst_26 {dimension_numbers = #tpu.dot_dimension_numbers<[1], [0], [0], [1], [0, 0, 1, 1], [], []>} : vector<1x32xf32>, vector<32x128xf32>, vector<1x128xf32> -> vector<1x128xf32>
    %69 = arith.addf %67, %68 : vector<1x128xf32>
    %70 = vector.extract_strided_slice %69 {offsets = [0, 0], sizes = [1, 32], strides = [1, 1]} : vector<1x128xf32> to vector<1x32xf32>
    %71 = arith.negf %70 : vector<1x32xf32>
    %72 = math.exp %71 : vector<1x32xf32>
    %cst_27 = arith.constant 1.000000e+00 : f32
    %73 = vector.broadcast %cst_27 : f32 to vector<1x32xf32>
    %74 = arith.addf %73, %72 : vector<1x32xf32>
    %75 = arith.divf %73, %74 : vector<1x32xf32>
    %76 = vector.extract_strided_slice %69 {offsets = [0, 32], sizes = [1, 32], strides = [1, 1]} : vector<1x128xf32> to vector<1x32xf32>
    %77 = arith.negf %76 : vector<1x32xf32>
    %78 = math.exp %77 : vector<1x32xf32>
    %cst_28 = arith.constant 1.000000e+00 : f32
    %79 = vector.broadcast %cst_28 : f32 to vector<1x32xf32>
    %80 = arith.addf %79, %78 : vector<1x32xf32>
    %81 = arith.divf %79, %80 : vector<1x32xf32>
    %82 = vector.extract_strided_slice %69 {offsets = [0, 64], sizes = [1, 32], strides = [1, 1]} : vector<1x128xf32> to vector<1x32xf32>
    %83 = math.tanh %82 : vector<1x32xf32>
    %84 = vector.extract_strided_slice %69 {offsets = [0, 96], sizes = [1, 32], strides = [1, 1]} : vector<1x128xf32> to vector<1x32xf32>
    %85 = arith.negf %84 : vector<1x32xf32>
    %86 = math.exp %85 : vector<1x32xf32>
    %cst_29 = arith.constant 1.000000e+00 : f32
    %87 = vector.broadcast %cst_29 : f32 to vector<1x32xf32>
    %88 = arith.addf %87, %86 : vector<1x32xf32>
    %89 = arith.divf %87, %88 : vector<1x32xf32>
    %90 = arith.mulf %81, %61 : vector<1x32xf32>
    %91 = arith.mulf %75, %83 : vector<1x32xf32>
    %92 = arith.addf %90, %91 : vector<1x32xf32>
    %93 = math.tanh %92 : vector<1x32xf32>
    %94 = arith.mulf %89, %93 : vector<1x32xf32>
    %95 = vector.extract_strided_slice %26 {offsets = [2, 0], sizes = [1, 128], strides = [1, 1]} : vector<8x128xf32> to vector<1x128xf32>
    %96 = vector.extract_strided_slice %28 {offsets = [5, 0], sizes = [1, 128], strides = [1, 1]} : vector<8x128xf32> to vector<1x128xf32>
    %97 = arith.addf %95, %96 : vector<1x128xf32>
    %98 = arith.addf %97, %30 : vector<1x128xf32>
    %cst_30 = arith.constant dense<0.000000e+00> : vector<1x128xf32>
    %99 = tpu.matmul %94, %29, %cst_30 {dimension_numbers = #tpu.dot_dimension_numbers<[1], [0], [0], [1], [0, 0, 1, 1], [], []>} : vector<1x32xf32>, vector<32x128xf32>, vector<1x128xf32> -> vector<1x128xf32>
    %100 = arith.addf %98, %99 : vector<1x128xf32>
    %101 = vector.extract_strided_slice %100 {offsets = [0, 0], sizes = [1, 32], strides = [1, 1]} : vector<1x128xf32> to vector<1x32xf32>
    %102 = arith.negf %101 : vector<1x32xf32>
    %103 = math.exp %102 : vector<1x32xf32>
    %cst_31 = arith.constant 1.000000e+00 : f32
    %104 = vector.broadcast %cst_31 : f32 to vector<1x32xf32>
    %105 = arith.addf %104, %103 : vector<1x32xf32>
    %106 = arith.divf %104, %105 : vector<1x32xf32>
    %107 = vector.extract_strided_slice %100 {offsets = [0, 32], sizes = [1, 32], strides = [1, 1]} : vector<1x128xf32> to vector<1x32xf32>
    %108 = arith.negf %107 : vector<1x32xf32>
    %109 = math.exp %108 : vector<1x32xf32>
    %cst_32 = arith.constant 1.000000e+00 : f32
    %110 = vector.broadcast %cst_32 : f32 to vector<1x32xf32>
    %111 = arith.addf %110, %109 : vector<1x32xf32>
    %112 = arith.divf %110, %111 : vector<1x32xf32>
    %113 = vector.extract_strided_slice %100 {offsets = [0, 64], sizes = [1, 32], strides = [1, 1]} : vector<1x128xf32> to vector<1x32xf32>
    %114 = math.tanh %113 : vector<1x32xf32>
    %115 = vector.extract_strided_slice %100 {offsets = [0, 96], sizes = [1, 32], strides = [1, 1]} : vector<1x128xf32> to vector<1x32xf32>
    %116 = arith.negf %115 : vector<1x32xf32>
    %117 = math.exp %116 : vector<1x32xf32>
    %cst_33 = arith.constant 1.000000e+00 : f32
    %118 = vector.broadcast %cst_33 : f32 to vector<1x32xf32>
    %119 = arith.addf %118, %117 : vector<1x32xf32>
    %120 = arith.divf %118, %119 : vector<1x32xf32>
    %121 = arith.mulf %112, %92 : vector<1x32xf32>
    %122 = arith.mulf %106, %114 : vector<1x32xf32>
    %123 = arith.addf %121, %122 : vector<1x32xf32>
    %124 = math.tanh %123 : vector<1x32xf32>
    %125 = arith.mulf %120, %124 : vector<1x32xf32>
    %126 = vector.extract_strided_slice %26 {offsets = [3, 0], sizes = [1, 128], strides = [1, 1]} : vector<8x128xf32> to vector<1x128xf32>
    %127 = vector.extract_strided_slice %28 {offsets = [4, 0], sizes = [1, 128], strides = [1, 1]} : vector<8x128xf32> to vector<1x128xf32>
    %128 = arith.addf %126, %127 : vector<1x128xf32>
    %129 = arith.addf %128, %30 : vector<1x128xf32>
    %cst_34 = arith.constant dense<0.000000e+00> : vector<1x128xf32>
    %130 = tpu.matmul %125, %29, %cst_34 {dimension_numbers = #tpu.dot_dimension_numbers<[1], [0], [0], [1], [0, 0, 1, 1], [], []>} : vector<1x32xf32>, vector<32x128xf32>, vector<1x128xf32> -> vector<1x128xf32>
    %131 = arith.addf %129, %130 : vector<1x128xf32>
    %132 = vector.extract_strided_slice %131 {offsets = [0, 0], sizes = [1, 32], strides = [1, 1]} : vector<1x128xf32> to vector<1x32xf32>
    %133 = arith.negf %132 : vector<1x32xf32>
    %134 = math.exp %133 : vector<1x32xf32>
    %cst_35 = arith.constant 1.000000e+00 : f32
    %135 = vector.broadcast %cst_35 : f32 to vector<1x32xf32>
    %136 = arith.addf %135, %134 : vector<1x32xf32>
    %137 = arith.divf %135, %136 : vector<1x32xf32>
    %138 = vector.extract_strided_slice %131 {offsets = [0, 32], sizes = [1, 32], strides = [1, 1]} : vector<1x128xf32> to vector<1x32xf32>
    %139 = arith.negf %138 : vector<1x32xf32>
    %140 = math.exp %139 : vector<1x32xf32>
    %cst_36 = arith.constant 1.000000e+00 : f32
    %141 = vector.broadcast %cst_36 : f32 to vector<1x32xf32>
    %142 = arith.addf %141, %140 : vector<1x32xf32>
    %143 = arith.divf %141, %142 : vector<1x32xf32>
    %144 = vector.extract_strided_slice %131 {offsets = [0, 64], sizes = [1, 32], strides = [1, 1]} : vector<1x128xf32> to vector<1x32xf32>
    %145 = math.tanh %144 : vector<1x32xf32>
    %146 = vector.extract_strided_slice %131 {offsets = [0, 96], sizes = [1, 32], strides = [1, 1]} : vector<1x128xf32> to vector<1x32xf32>
    %147 = arith.negf %146 : vector<1x32xf32>
    %148 = math.exp %147 : vector<1x32xf32>
    %cst_37 = arith.constant 1.000000e+00 : f32
    %149 = vector.broadcast %cst_37 : f32 to vector<1x32xf32>
    %150 = arith.addf %149, %148 : vector<1x32xf32>
    %151 = arith.divf %149, %150 : vector<1x32xf32>
    %152 = arith.mulf %143, %123 : vector<1x32xf32>
    %153 = arith.mulf %137, %145 : vector<1x32xf32>
    %154 = arith.addf %152, %153 : vector<1x32xf32>
    %155 = math.tanh %154 : vector<1x32xf32>
    %156 = arith.mulf %151, %155 : vector<1x32xf32>
    %157 = vector.extract_strided_slice %26 {offsets = [4, 0], sizes = [1, 128], strides = [1, 1]} : vector<8x128xf32> to vector<1x128xf32>
    %158 = vector.extract_strided_slice %28 {offsets = [3, 0], sizes = [1, 128], strides = [1, 1]} : vector<8x128xf32> to vector<1x128xf32>
    %159 = arith.addf %157, %158 : vector<1x128xf32>
    %160 = arith.addf %159, %30 : vector<1x128xf32>
    %cst_38 = arith.constant dense<0.000000e+00> : vector<1x128xf32>
    %161 = tpu.matmul %156, %29, %cst_38 {dimension_numbers = #tpu.dot_dimension_numbers<[1], [0], [0], [1], [0, 0, 1, 1], [], []>} : vector<1x32xf32>, vector<32x128xf32>, vector<1x128xf32> -> vector<1x128xf32>
    %162 = arith.addf %160, %161 : vector<1x128xf32>
    %163 = vector.extract_strided_slice %162 {offsets = [0, 0], sizes = [1, 32], strides = [1, 1]} : vector<1x128xf32> to vector<1x32xf32>
    %164 = arith.negf %163 : vector<1x32xf32>
    %165 = math.exp %164 : vector<1x32xf32>
    %cst_39 = arith.constant 1.000000e+00 : f32
    %166 = vector.broadcast %cst_39 : f32 to vector<1x32xf32>
    %167 = arith.addf %166, %165 : vector<1x32xf32>
    %168 = arith.divf %166, %167 : vector<1x32xf32>
    %169 = vector.extract_strided_slice %162 {offsets = [0, 32], sizes = [1, 32], strides = [1, 1]} : vector<1x128xf32> to vector<1x32xf32>
    %170 = arith.negf %169 : vector<1x32xf32>
    %171 = math.exp %170 : vector<1x32xf32>
    %cst_40 = arith.constant 1.000000e+00 : f32
    %172 = vector.broadcast %cst_40 : f32 to vector<1x32xf32>
    %173 = arith.addf %172, %171 : vector<1x32xf32>
    %174 = arith.divf %172, %173 : vector<1x32xf32>
    %175 = vector.extract_strided_slice %162 {offsets = [0, 64], sizes = [1, 32], strides = [1, 1]} : vector<1x128xf32> to vector<1x32xf32>
    %176 = math.tanh %175 : vector<1x32xf32>
    %177 = vector.extract_strided_slice %162 {offsets = [0, 96], sizes = [1, 32], strides = [1, 1]} : vector<1x128xf32> to vector<1x32xf32>
    %178 = arith.negf %177 : vector<1x32xf32>
    %179 = math.exp %178 : vector<1x32xf32>
    %cst_41 = arith.constant 1.000000e+00 : f32
    %180 = vector.broadcast %cst_41 : f32 to vector<1x32xf32>
    %181 = arith.addf %180, %179 : vector<1x32xf32>
    %182 = arith.divf %180, %181 : vector<1x32xf32>
    %183 = arith.mulf %174, %154 : vector<1x32xf32>
    %184 = arith.mulf %168, %176 : vector<1x32xf32>
    %185 = arith.addf %183, %184 : vector<1x32xf32>
    %186 = math.tanh %185 : vector<1x32xf32>
    %187 = arith.mulf %182, %186 : vector<1x32xf32>
    %188 = vector.extract_strided_slice %26 {offsets = [5, 0], sizes = [1, 128], strides = [1, 1]} : vector<8x128xf32> to vector<1x128xf32>
    %189 = vector.extract_strided_slice %28 {offsets = [2, 0], sizes = [1, 128], strides = [1, 1]} : vector<8x128xf32> to vector<1x128xf32>
    %190 = arith.addf %188, %189 : vector<1x128xf32>
    %191 = arith.addf %190, %30 : vector<1x128xf32>
    %cst_42 = arith.constant dense<0.000000e+00> : vector<1x128xf32>
    %192 = tpu.matmul %187, %29, %cst_42 {dimension_numbers = #tpu.dot_dimension_numbers<[1], [0], [0], [1], [0, 0, 1, 1], [], []>} : vector<1x32xf32>, vector<32x128xf32>, vector<1x128xf32> -> vector<1x128xf32>
    %193 = arith.addf %191, %192 : vector<1x128xf32>
    %194 = vector.extract_strided_slice %193 {offsets = [0, 0], sizes = [1, 32], strides = [1, 1]} : vector<1x128xf32> to vector<1x32xf32>
    %195 = arith.negf %194 : vector<1x32xf32>
    %196 = math.exp %195 : vector<1x32xf32>
    %cst_43 = arith.constant 1.000000e+00 : f32
    %197 = vector.broadcast %cst_43 : f32 to vector<1x32xf32>
    %198 = arith.addf %197, %196 : vector<1x32xf32>
    %199 = arith.divf %197, %198 : vector<1x32xf32>
    %200 = vector.extract_strided_slice %193 {offsets = [0, 32], sizes = [1, 32], strides = [1, 1]} : vector<1x128xf32> to vector<1x32xf32>
    %201 = arith.negf %200 : vector<1x32xf32>
    %202 = math.exp %201 : vector<1x32xf32>
    %cst_44 = arith.constant 1.000000e+00 : f32
    %203 = vector.broadcast %cst_44 : f32 to vector<1x32xf32>
    %204 = arith.addf %203, %202 : vector<1x32xf32>
    %205 = arith.divf %203, %204 : vector<1x32xf32>
    %206 = vector.extract_strided_slice %193 {offsets = [0, 64], sizes = [1, 32], strides = [1, 1]} : vector<1x128xf32> to vector<1x32xf32>
    %207 = math.tanh %206 : vector<1x32xf32>
    %208 = vector.extract_strided_slice %193 {offsets = [0, 96], sizes = [1, 32], strides = [1, 1]} : vector<1x128xf32> to vector<1x32xf32>
    %209 = arith.negf %208 : vector<1x32xf32>
    %210 = math.exp %209 : vector<1x32xf32>
    %cst_45 = arith.constant 1.000000e+00 : f32
    %211 = vector.broadcast %cst_45 : f32 to vector<1x32xf32>
    %212 = arith.addf %211, %210 : vector<1x32xf32>
    %213 = arith.divf %211, %212 : vector<1x32xf32>
    %214 = arith.mulf %205, %185 : vector<1x32xf32>
    %215 = arith.mulf %199, %207 : vector<1x32xf32>
    %216 = arith.addf %214, %215 : vector<1x32xf32>
    %217 = math.tanh %216 : vector<1x32xf32>
    %218 = arith.mulf %213, %217 : vector<1x32xf32>
    %219 = vector.extract_strided_slice %26 {offsets = [6, 0], sizes = [1, 128], strides = [1, 1]} : vector<8x128xf32> to vector<1x128xf32>
    %220 = vector.extract_strided_slice %28 {offsets = [1, 0], sizes = [1, 128], strides = [1, 1]} : vector<8x128xf32> to vector<1x128xf32>
    %221 = arith.addf %219, %220 : vector<1x128xf32>
    %222 = arith.addf %221, %30 : vector<1x128xf32>
    %cst_46 = arith.constant dense<0.000000e+00> : vector<1x128xf32>
    %223 = tpu.matmul %218, %29, %cst_46 {dimension_numbers = #tpu.dot_dimension_numbers<[1], [0], [0], [1], [0, 0, 1, 1], [], []>} : vector<1x32xf32>, vector<32x128xf32>, vector<1x128xf32> -> vector<1x128xf32>
    %224 = arith.addf %222, %223 : vector<1x128xf32>
    %225 = vector.extract_strided_slice %224 {offsets = [0, 0], sizes = [1, 32], strides = [1, 1]} : vector<1x128xf32> to vector<1x32xf32>
    %226 = arith.negf %225 : vector<1x32xf32>
    %227 = math.exp %226 : vector<1x32xf32>
    %cst_47 = arith.constant 1.000000e+00 : f32
    %228 = vector.broadcast %cst_47 : f32 to vector<1x32xf32>
    %229 = arith.addf %228, %227 : vector<1x32xf32>
    %230 = arith.divf %228, %229 : vector<1x32xf32>
    %231 = vector.extract_strided_slice %224 {offsets = [0, 32], sizes = [1, 32], strides = [1, 1]} : vector<1x128xf32> to vector<1x32xf32>
    %232 = arith.negf %231 : vector<1x32xf32>
    %233 = math.exp %232 : vector<1x32xf32>
    %cst_48 = arith.constant 1.000000e+00 : f32
    %234 = vector.broadcast %cst_48 : f32 to vector<1x32xf32>
    %235 = arith.addf %234, %233 : vector<1x32xf32>
    %236 = arith.divf %234, %235 : vector<1x32xf32>
    %237 = vector.extract_strided_slice %224 {offsets = [0, 64], sizes = [1, 32], strides = [1, 1]} : vector<1x128xf32> to vector<1x32xf32>
    %238 = math.tanh %237 : vector<1x32xf32>
    %239 = vector.extract_strided_slice %224 {offsets = [0, 96], sizes = [1, 32], strides = [1, 1]} : vector<1x128xf32> to vector<1x32xf32>
    %240 = arith.negf %239 : vector<1x32xf32>
    %241 = math.exp %240 : vector<1x32xf32>
    %cst_49 = arith.constant 1.000000e+00 : f32
    %242 = vector.broadcast %cst_49 : f32 to vector<1x32xf32>
    %243 = arith.addf %242, %241 : vector<1x32xf32>
    %244 = arith.divf %242, %243 : vector<1x32xf32>
    %245 = arith.mulf %236, %216 : vector<1x32xf32>
    %246 = arith.mulf %230, %238 : vector<1x32xf32>
    %247 = arith.addf %245, %246 : vector<1x32xf32>
    %248 = math.tanh %247 : vector<1x32xf32>
    %249 = arith.mulf %244, %248 : vector<1x32xf32>
    %250 = vector.extract_strided_slice %26 {offsets = [7, 0], sizes = [1, 128], strides = [1, 1]} : vector<8x128xf32> to vector<1x128xf32>
    %251 = vector.extract_strided_slice %28 {offsets = [0, 0], sizes = [1, 128], strides = [1, 1]} : vector<8x128xf32> to vector<1x128xf32>
    %252 = arith.addf %250, %251 : vector<1x128xf32>
    %253 = arith.addf %252, %30 : vector<1x128xf32>
    %cst_50 = arith.constant dense<0.000000e+00> : vector<1x128xf32>
    %254 = tpu.matmul %249, %29, %cst_50 {dimension_numbers = #tpu.dot_dimension_numbers<[1], [0], [0], [1], [0, 0, 1, 1], [], []>} : vector<1x32xf32>, vector<32x128xf32>, vector<1x128xf32> -> vector<1x128xf32>
    %255 = arith.addf %253, %254 : vector<1x128xf32>
    %256 = vector.extract_strided_slice %255 {offsets = [0, 0], sizes = [1, 32], strides = [1, 1]} : vector<1x128xf32> to vector<1x32xf32>
    %257 = arith.negf %256 : vector<1x32xf32>
    %258 = math.exp %257 : vector<1x32xf32>
    %cst_51 = arith.constant 1.000000e+00 : f32
    %259 = vector.broadcast %cst_51 : f32 to vector<1x32xf32>
    %260 = arith.addf %259, %258 : vector<1x32xf32>
    %261 = arith.divf %259, %260 : vector<1x32xf32>
    %262 = vector.extract_strided_slice %255 {offsets = [0, 32], sizes = [1, 32], strides = [1, 1]} : vector<1x128xf32> to vector<1x32xf32>
    %263 = arith.negf %262 : vector<1x32xf32>
    %264 = math.exp %263 : vector<1x32xf32>
    %cst_52 = arith.constant 1.000000e+00 : f32
    %265 = vector.broadcast %cst_52 : f32 to vector<1x32xf32>
    %266 = arith.addf %265, %264 : vector<1x32xf32>
    %267 = arith.divf %265, %266 : vector<1x32xf32>
    %268 = vector.extract_strided_slice %255 {offsets = [0, 64], sizes = [1, 32], strides = [1, 1]} : vector<1x128xf32> to vector<1x32xf32>
    %269 = math.tanh %268 : vector<1x32xf32>
    %270 = vector.extract_strided_slice %255 {offsets = [0, 96], sizes = [1, 32], strides = [1, 1]} : vector<1x128xf32> to vector<1x32xf32>
    %271 = arith.negf %270 : vector<1x32xf32>
    %272 = math.exp %271 : vector<1x32xf32>
    %cst_53 = arith.constant 1.000000e+00 : f32
    %273 = vector.broadcast %cst_53 : f32 to vector<1x32xf32>
    %274 = arith.addf %273, %272 : vector<1x32xf32>
    %275 = arith.divf %273, %274 : vector<1x32xf32>
    %276 = arith.mulf %267, %247 : vector<1x32xf32>
    %277 = arith.mulf %261, %269 : vector<1x32xf32>
    %278 = arith.addf %276, %277 : vector<1x32xf32>
    %279 = math.tanh %278 : vector<1x32xf32>
    %280 = arith.mulf %275, %279 : vector<1x32xf32>
    %281 = tpu.concatenate %63, %94, %125, %156, %187, %218, %249, %280 in 0 : vector<1x32xf32>, vector<1x32xf32>, vector<1x32xf32>, vector<1x32xf32>, vector<1x32xf32>, vector<1x32xf32>, vector<1x32xf32>, vector<1x32xf32> -> vector<8x32xf32>
    %282 = tpu.concatenate %280, %249, %218, %187, %156, %125, %94, %63 in 0 : vector<1x32xf32>, vector<1x32xf32>, vector<1x32xf32>, vector<1x32xf32>, vector<1x32xf32>, vector<1x32xf32>, vector<1x32xf32>, vector<1x32xf32> -> vector<8x32xf32>
    %283 = vector.extract_strided_slice %281 {offsets = [0, 0], sizes = [8, 16], strides = [1, 1]} : vector<8x32xf32> to vector<8x16xf32>
    %284 = vector.extract_strided_slice %282 {offsets = [0, 16], sizes = [8, 16], strides = [1, 1]} : vector<8x32xf32> to vector<8x16xf32>
    %285 = tpu.concatenate %283, %284 in 1 : vector<8x16xf32>, vector<8x16xf32> -> vector<8x32xf32>
    %286 = vector.extract_strided_slice %285 {offsets = [0, 0], sizes = [7, 32], strides = [1, 1]} : vector<8x32xf32> to vector<7x32xf32>
    %c0_54 = arith.constant 0 : index
    %c0_55 = arith.constant 0 : index
    %287 = vector.load %arg8[%c0_54, %c0_55] : memref<32x32xf32, #tpu.memory_space<vmem>>, vector<32x32xf32>
    %cst_56 = arith.constant dense<0.000000e+00> : vector<7x32xf32>
    %288 = tpu.matmul %286, %287, %cst_56 {dimension_numbers = #tpu.dot_dimension_numbers<[1], [0], [0], [1], [0, 0, 1, 1], [], []>} : vector<7x32xf32>, vector<32x32xf32>, vector<7x32xf32> -> vector<7x32xf32>
    %289 = vector.extract_strided_slice %285 {offsets = [1, 0], sizes = [7, 32], strides = [1, 1]} : vector<8x32xf32> to vector<7x32xf32>
    %c0_57 = arith.constant 0 : index
    %c0_58 = arith.constant 0 : index
    %290 = vector.load %arg9[%c0_57, %c0_58] : memref<32x32xf32, #tpu.memory_space<vmem>>, vector<32x32xf32>
    %cst_59 = arith.constant dense<0.000000e+00> : vector<7x32xf32>
    %291 = tpu.matmul %289, %290, %cst_59 {dimension_numbers = #tpu.dot_dimension_numbers<[1], [0], [0], [1], [0, 0, 1, 1], [], []>} : vector<7x32xf32>, vector<32x32xf32>, vector<7x32xf32> -> vector<7x32xf32>
    %292 = arith.addf %288, %291 : vector<7x32xf32>
    %c0_60 = arith.constant 0 : index
    %c0_61 = arith.constant 0 : index
    %293 = vector.load %arg10[%c0_60, %c0_61] : memref<1x32xf32, #tpu.memory_space<vmem>>, vector<1x32xf32>
    %294 = vector.broadcast %293 : vector<1x32xf32> to vector<7x32xf32>
    %295 = arith.addf %292, %294 : vector<7x32xf32>
    %c0_62 = arith.constant 0 : index
    %c0_63 = arith.constant 0 : index
    %c0_64 = arith.constant 0 : index
    %296 = vector.load %arg11[%c0_62, %c0_63, %c0_64] : memref<1x8x32xf32, #tpu.memory_space<vmem>>, vector<1x8x32xf32>
    %297 = vector.shape_cast %296 : vector<1x8x32xf32> to vector<8x32xf32>
    %298 = vector.shape_cast %285 : vector<8x32xf32> to vector<1x8x32xf32>
    tpu.vector_store %arg11[%c0_62, %c0_63, %c0_64], %298 {strides = array<i32>} : memref<1x8x32xf32, #tpu.memory_space<vmem>>, vector<1x8x32xf32>,
    %c0_65 = arith.constant 0 : index
    %c0_66 = arith.constant 0 : index
    %c0_67 = arith.constant 0 : index
    %299 = vector.load %arg12[%c0_65, %c0_66, %c0_67] : memref<1x7x32xf32, #tpu.memory_space<vmem>>, vector<1x7x32xf32>
    %300 = vector.shape_cast %299 : vector<1x7x32xf32> to vector<7x32xf32>
    %301 = vector.shape_cast %295 : vector<7x32xf32> to vector<1x7x32xf32>
    tpu.vector_store %arg12[%c0_65, %c0_66, %c0_67], %301 {strides = array<i32>} : memref<1x7x32xf32, #tpu.memory_space<vmem>>, vector<1x7x32xf32>,
    return
  }
  func.func @transform_0(%arg0: i32) -> (i32, i32, i32) {
    %c0_i32 = arith.constant 0 : i32
    %c0_i32_0 = arith.constant 0 : i32
    %c0_i32_1 = arith.constant 0 : i32
    return %arg0, %c0_i32, %c0_i32_0 : i32, i32, i32
  }
  func.func @transform_1(%arg0: i32) -> (i32, i32) {
    %c0_i32 = arith.constant 0 : i32
    %c0_i32_0 = arith.constant 0 : i32
    %c0_i32_1 = arith.constant 0 : i32
    return %c0_i32, %c0_i32_0 : i32, i32
  }
  func.func @transform_2(%arg0: i32) -> (i32, i32) {
    %c0_i32 = arith.constant 0 : i32
    %c0_i32_0 = arith.constant 0 : i32
    %c0_i32_1 = arith.constant 0 : i32
    return %c0_i32, %c0_i32_0 : i32, i32
  }
  func.func @transform_3(%arg0: i32) -> (i32, i32) {
    %c0_i32 = arith.constant 0 : i32
    %c0_i32_0 = arith.constant 0 : i32
    %c0_i32_1 = arith.constant 0 : i32
    return %c0_i32, %c0_i32_0 : i32, i32
  }
  func.func @transform_4(%arg0: i32) -> (i32, i32) {
    %c0_i32 = arith.constant 0 : i32
    %c0_i32_0 = arith.constant 0 : i32
    %c0_i32_1 = arith.constant 0 : i32
    return %c0_i32, %c0_i32_0 : i32, i32
  }
  func.func @transform_5(%arg0: i32) -> (i32, i32) {
    %c0_i32 = arith.constant 0 : i32
    %c0_i32_0 = arith.constant 0 : i32
    %c0_i32_1 = arith.constant 0 : i32
    return %c0_i32, %c0_i32_0 : i32, i32
  }
  func.func @transform_6(%arg0: i32) -> (i32, i32) {
    %c0_i32 = arith.constant 0 : i32
    %c0_i32_0 = arith.constant 0 : i32
    %c0_i32_1 = arith.constant 0 : i32
    return %c0_i32, %c0_i32_0 : i32, i32
  }
  func.func @transform_7(%arg0: i32) -> (i32, i32) {
    %c0_i32 = arith.constant 0 : i32
    %c0_i32_0 = arith.constant 0 : i32
    %c0_i32_1 = arith.constant 0 : i32
    return %c0_i32, %c0_i32_0 : i32, i32
  }
  func.func @transform_8(%arg0: i32) -> (i32, i32) {
    %c0_i32 = arith.constant 0 : i32
    %c0_i32_0 = arith.constant 0 : i32
    %c0_i32_1 = arith.constant 0 : i32
    return %c0_i32, %c0_i32_0 : i32, i32
  }
  func.func @transform_9(%arg0: i32) -> (i32, i32) {
    %c0_i32 = arith.constant 0 : i32
    %c0_i32_0 = arith.constant 0 : i32
    %c0_i32_1 = arith.constant 0 : i32
    return %c0_i32, %c0_i32_0 : i32, i32
  }
  func.func @transform_10(%arg0: i32) -> (i32, i32, i32) {
    %c0_i32 = arith.constant 0 : i32
    %c0_i32_0 = arith.constant 0 : i32
    %c0_i32_1 = arith.constant 0 : i32
    return %arg0, %c0_i32, %c0_i32_0 : i32, i32, i32
  }
  func.func @transform_11(%arg0: i32) -> (i32, i32, i32) {
    %c0_i32 = arith.constant 0 : i32
    %c0_i32_0 = arith.constant 0 : i32
    %c0_i32_1 = arith.constant 0 : i32
    return %arg0, %c0_i32, %c0_i32_0 : i32, i32, i32
  }
}

</mosaic_0001>

<bundles_post_ra>
// kernel: decoding_layer_forward.1
= control target key start
LH: loop header
LB: loop body
LE: loop exit
PB: predicated region body
PF: predicated region fallthrough
CT: control target
= control target key end

     0   :  { %s3317_s0 = inlined_call_operand.hbm [shape: f32[2,8,32], index: 0, kind: input, shape index: {}]   ;;  %s3318_s1 = inlined_call_operand.hbm [shape: f32[8,32], index: 1, kind: input, shape index: {}]   ;;  %s3319_s2 = inlined_call_operand.hbm [shape: f32[8,32], index: 2, kind: input, shape index: {}]   ;;  %s3320_s3 = inlined_call_operand.vmem [shape: f32[32,128], index: 3, kind: input, shape index: {}]   ;;  %s3321_s4 = inlined_call_operand.hbm [shape: f32[32,128], index: 4, kind: input, shape index: {}]   ;;  %s3322_s5 = inlined_call_operand.hbm [shape: f32[32,128], index: 5, kind: input, shape index: {}]   ;;  %s3323_s6 = inlined_call_operand.vmem [shape: f32[1,128], index: 6, kind: input, shape index: {}]   ;;  %s3324_s7 = inlined_call_operand.hbm [shape: f32[32,32], index: 7, kind: input, shape index: {}]   ;;  %s3325_s8 = inlined_call_operand.hbm [shape: f32[32,32], index: 8, kind: input, shape index: {}]   ;;  %s3326_s9 = inlined_call_operand.vmem [shape: f32[1,32], index: 9, kind: input, shape index: {}]   ;;  %s3327_s10 = inlined_call_operand.hbm [shape: f32[2,8,32], index: 10, kind: output, shape index: {0}]   ;;  %s3328_s11 = inlined_call_operand.vmem [shape: f32[2,7,32], index: 11, kind: output, shape index: {1}]  }
   0x1   :  { %3332 = sst [smem:[#allocation20_spill]] %s3318_s1 }
   0x2   :  { %3333 = sst [smem:[#allocation21_spill]] %s3321_s4 }
   0x3   :  { %3334 = sst [smem:[#allocation22_spill]] %s3326_s9 }
   0x4   :  { %3335 = sst [smem:[#allocation23_spill]] %s3328_s11 }
   0x5   :  { %17 = vsyncpa [#allocation3], 0 }
   0x6   :  { %19 = vsyncpa [#allocation3 + $0x1], 0 }
   0x7   :  { %20 = vsyncpa [#allocation6], 0 }
   0x8   :  { %21 = vsyncpa [#allocation9], 0 }
   0x9   :  { %22 = vsyncpa [#allocation12], 0 }
   0xa   :  { %23 = vsyncpa [#allocation4], 0 }
   0xb   :  { %25 = vsyncpa [#allocation4 + $0x1], 0  ;;  %s2796_s17 = smov 0   ;;  %s2798_s18 = smov 0  }
   0xc   :  { %s2800_s19 = smov 0   ;;  %s2802_s20 = smov 0  }
   0xd LB: > { %s2721_s21 = smov [#allocation5]   ;;  %s2817_s23 = sadd.s32 4294967295, %s2719_s20   ;;  %s2719_s20 = sphi %s2802_s20, %s3362_s20   ;;  %s2715_s19 = sphi %s2800_s19, %s3361_s19   ;;  %s2711_s18 = sphi %s2798_s18, %s3360_s18   ;;  %s2707_s17 = sphi %s2796_s17, %s3359_s17  }
   0xe   : > { %s316_s22 = sshll.u32 %s2721_s21, 4  ;;  %p1949_p0 = scmp.ge.s32.totalorder %s2719_s20, 1  ;;  %s317_s22 = int_to_ptr.vmem [resolvable:$true] %s316_s22 }
   0xf   : > { %p3329_p1 = scmp.eq.s32.totalorder %s2817_s23, 0  ;;  %p303_p2 = scmp.lt.s32.totalorder %s2719_s20, 3 }
  0x10   : > { %s2722_s25 = smov [#allocation8]   ;;  %s2723_s28 = smov [#allocation11]  }
  0x11   : > { %p2822_p3 = pnand %p1949_p0, %p303_p2  ;;  %s340_s26 = sshll.u32 %s2722_s25, 4  ;;  %s2829_s26 = int_to_ptr.vmem [resolvable:$true] %s340_s26 }
  0x12   : > { %s369_s29 = sshll.u32 %s2723_s28, 4  ;;  %s3338_s1 = sld [smem:[#allocation20_spill]]  ;;  %s2837_s29 = int_to_ptr.vmem [resolvable:$true] %s369_s29 }
  0x13   : > { %s3336_s24 = scalar_select %p2822_p3, 1, 0 }
  0x14   : > { %p2291_p5 = pneg %p2822_p3 }
  0x16   : > { %p2833_p6 = pnand %p2291_p5, %p3329_p1 }
  0x18   : > { %s2443_s13 = scalar_lea.hbm %s3338_s1, 128  ;;  %p2847_p8 = pneg %p2833_p6 }
  0x19   : > { %p2444_p7 = scmp.ne.s32.totalorder %s3338_s1, %s2443_s13  ;;  %p2450_p11 = scmp.lt.u32.totalorder %s2443_s13, %s3338_s1 }
  0x1b   : > { %p2446_p9 = pnand %p2847_p8, %p2444_p7 }
  0x1d   : > { %p2447_p10 = pneg %p2446_p9 }
  0x1f   : > { %p2452_p12 = pnand %p2450_p11, %p2447_p10 }
  0x21   : > { %2455 = shalt.err (!%p2452_p12)
}
  0x22   : > { %s2456_s28 = scalar_lea.vmem %s317_s22, 128  ;;  %p2464_p5 = scmp.lt.s32.totalorder %s317_s22, %s317_s22 }
  0x23   : > { %p2457_p13 = scmp.ne.s32.totalorder %s317_s22, %s2456_s28  ;;  %p2465_p4 = scmp.lt.s32.totalorder %s2456_s28, %s2456_s28 }
  0x25   : > { %p2459_p0 = pnand %p2457_p13, %p2847_p8  ;;  %p2466_p1 = por %p2465_p4, %p2464_p5 }
  0x27   : > { %p2460_p2 = pneg %p2459_p0 }
  0x29   : > { %p2467_p3 = pnand %p2466_p1, %p2460_p2 }
  0x2b   : > { %2470 = shalt.err (!%p2467_p3)
}
  0x2c   : > { %2294 = dma.hbm_to_vmem [thread:$0]  (!%p2833_p6), %s3338_s1, 128, %s317_s22, [#allocation6]  }
  0x2d   : > { %s3340_s4 = sld [smem:[#allocation21_spill]] }
  0x33   : > { %s2471_s15 = scalar_lea.hbm %s3340_s4, 512 }
  0x34   : > { %p2472_p7 = scmp.ne.s32.totalorder %s3340_s4, %s2471_s15  ;;  %p2478_p1 = scmp.lt.u32.totalorder %s2471_s15, %s3340_s4 }
  0x36   : > { %p2474_p9 = pnand %p2472_p7, %p2847_p8 }
  0x38   : > { %p2475_p4 = pneg %p2474_p9 }
  0x3a   : > { %p2480_p3 = pnand %p2478_p1, %p2475_p4 }
  0x3c   : > { %2483 = shalt.err (!%p2480_p3)
}
  0x3d   : > { %s2484_s22 = scalar_lea.vmem %s2829_s26, 512  ;;  %p2492_p13 = scmp.lt.s32.totalorder %s2829_s26, %s2829_s26 }
  0x3e   : > { %p2485_p10 = scmp.ne.s32.totalorder %s2829_s26, %s2484_s22  ;;  %p2493_p0 = scmp.lt.s32.totalorder %s2484_s22, %s2484_s22 }
  0x40   : > { %p2487_p11 = pnand %p2485_p10, %p2847_p8  ;;  %p2494_p2 = por %p2493_p0, %p2492_p13 }
  0x42   : > { %p2488_p12 = pneg %p2487_p11 }
  0x44   : > { %p2495_p5 = pnand %p2494_p2, %p2488_p12 }
  0x46   : > { %2498 = shalt.err (!%p2495_p5)
}
  0x47   : > { %s2724_s30 = smov 128   ;;  %s2725_s11 = smov 8  }
  0x48   : > { %2300 = dma.hbm_to_vmem [thread:$0]  (!%p2833_p6), %s3340_s4, 512, %s2829_s26, [#allocation9], %s2724_s30, %s2724_s30, %s2725_s11  }
  0x49   : > { %s2499_s21 = scalar_lea.hbm %s3324_s7, 512 }
  0x4a   : > { %p2500_p7 = scmp.ne.s32.totalorder %s3324_s7, %s2499_s21  ;;  %p2506_p1 = scmp.lt.u32.totalorder %s2499_s21, %s3324_s7 }
  0x4c   : > { %p2502_p9 = pnand %p2500_p7, %p2847_p8 }
  0x4e   : > { %p2503_p4 = pneg %p2502_p9 }
  0x50   : > { %p2508_p3 = pnand %p2506_p1, %p2503_p4 }
  0x52   : > { %2511 = shalt.err (!%p2508_p3)
}
  0x53   : > { %s2512_s26 = scalar_lea.vmem %s2837_s29, 512  ;;  %p2520_p13 = scmp.lt.s32.totalorder %s2837_s29, %s2837_s29 }
  0x54   : > { %p2513_p10 = scmp.ne.s32.totalorder %s2837_s29, %s2512_s26  ;;  %p2521_p0 = scmp.lt.s32.totalorder %s2512_s26, %s2512_s26 }
  0x56   : > { %p2515_p11 = pnand %p2513_p10, %p2847_p8  ;;  %p2522_p2 = por %p2521_p0, %p2520_p13 }
  0x58   : > { %p2516_p12 = pneg %p2515_p11 }
  0x5a   : > { %p2523_p5 = pnand %p2522_p2, %p2516_p12 }
  0x5c   : > { %2526 = shalt.err (!%p2523_p5)
}
  0x5d   : > { %2306 = dma.hbm_to_vmem [thread:$0]  (!%p2833_p6), %s3324_s7, 512, %s2837_s29, [#allocation12], %s2724_s30, %s2724_s30, %s2725_s11  }
  0x5e   : > { %s2726_s13 = smov [#allocation7]   ;;  %s2727_s15 = smov [#allocation10]  }
  0x5f   : > { %s327_s14 = sshll.u32 %s2726_s13, 4  ;;  %s353_s21 = sshll.u32 %s2727_s15, 4  ;;  %s328_s14 = int_to_ptr.vmem [resolvable:$true] %s327_s14  ;;  %s354_s21 = int_to_ptr.vmem [resolvable:$true] %s353_s21 }
  0x60   : > { %s2527_s22 = scalar_lea.hbm %s3319_s2, 128 }
  0x61   : > { %p2528_p7 = scmp.ne.s32.totalorder %s3319_s2, %s2527_s22  ;;  %p2534_p1 = scmp.lt.u32.totalorder %s2527_s22, %s3319_s2 }
  0x63   : > { %p2530_p9 = pnand %p2528_p7, %p2847_p8 }
  0x65   : > { %p2531_p4 = pneg %p2530_p9 }
  0x67   : > { %p2536_p3 = pnand %p2534_p1, %p2531_p4 }
  0x69   : > { %2539 = shalt.err (!%p2536_p3)
}
  0x6a   : > { %s2540_s29 = scalar_lea.vmem %s328_s14, 128  ;;  %p2548_p13 = scmp.lt.s32.totalorder %s328_s14, %s328_s14 }
  0x6b   : > { %p2541_p10 = scmp.ne.s32.totalorder %s328_s14, %s2540_s29  ;;  %p2549_p0 = scmp.lt.s32.totalorder %s2540_s29, %s2540_s29 }
  0x6d   : > { %p2543_p11 = pnand %p2541_p10, %p2847_p8  ;;  %p2550_p2 = por %p2549_p0, %p2548_p13 }
  0x6f   : > { %p2544_p12 = pneg %p2543_p11 }
  0x71   : > { %p2551_p5 = pnand %p2550_p2, %p2544_p12 }
  0x73   : > { %2554 = shalt.err (!%p2551_p5)
}
  0x74   : > { %2297 = dma.hbm_to_vmem [thread:$0]  (!%p2833_p6), %s3319_s2, 128, %s328_s14, [#allocation6]  }
  0x75   : > { %s2555_s15 = scalar_lea.hbm %s3322_s5, 512 }
  0x76   : > { %p2556_p7 = scmp.ne.s32.totalorder %s3322_s5, %s2555_s15  ;;  %p2562_p1 = scmp.lt.u32.totalorder %s2555_s15, %s3322_s5 }
  0x78   : > { %p2558_p9 = pnand %p2556_p7, %p2847_p8 }
  0x7a   : > { %p2559_p4 = pneg %p2558_p9 }
  0x7c   : > { %p2564_p3 = pnand %p2562_p1, %p2559_p4 }
  0x7e   : > { %2567 = shalt.err (!%p2564_p3)
}
  0x7f   : > { %s2568_s1 = scalar_lea.vmem %s354_s21, 512  ;;  %p2576_p13 = scmp.lt.s32.totalorder %s354_s21, %s354_s21 }
  0x80   : > { %p2569_p10 = scmp.ne.s32.totalorder %s354_s21, %s2568_s1  ;;  %p2577_p0 = scmp.lt.s32.totalorder %s2568_s1, %s2568_s1 }
  0x82   : > { %p2571_p11 = pnand %p2569_p10, %p2847_p8  ;;  %p2578_p2 = por %p2577_p0, %p2576_p13 }
  0x84   : > { %p2572_p12 = pneg %p2571_p11 }
  0x86   : > { %p2579_p5 = pnand %p2578_p2, %p2572_p12 }
  0x88   : > { %2582 = shalt.err (!%p2579_p5)
}
  0x89   : > { %2303 = dma.hbm_to_vmem [thread:$0]  (!%p2833_p6), %s3322_s5, 512, %s354_s21, [#allocation9], %s2724_s30, %s2724_s30, %s2725_s11  }
  0x8a   : > { %s2728_s4 = smov [#allocation13]   ;;  %s2583_s15 = scalar_lea.hbm %s3325_s8, 512 }
  0x8b   : > { %s382_s12 = sshll.u32 %s2728_s4, 4  ;;  %p2584_p7 = scmp.ne.s32.totalorder %s3325_s8, %s2583_s15  ;;  %s383_s12 = int_to_ptr.vmem [resolvable:$true] %s382_s12 }
  0x8c   : > { %p2590_p1 = scmp.lt.u32.totalorder %s2583_s15, %s3325_s8 }
  0x8d   : > { %p2586_p9 = pnand %p2584_p7, %p2847_p8 }
  0x8f   : > { %p2587_p4 = pneg %p2586_p9 }
  0x91   : > { %p2592_p3 = pnand %p2590_p1, %p2587_p4 }
  0x93   : > { %2595 = shalt.err (!%p2592_p3)
}
  0x94   : > { %s2596_s21 = scalar_lea.vmem %s383_s12, 512  ;;  %p2604_p13 = scmp.lt.s32.totalorder %s383_s12, %s383_s12 }
  0x95   : > { %p2597_p10 = scmp.ne.s32.totalorder %s383_s12, %s2596_s21  ;;  %p2605_p0 = scmp.lt.s32.totalorder %s2596_s21, %s2596_s21 }
  0x97   : > { %p2599_p11 = pnand %p2597_p10, %p2847_p8  ;;  %p2606_p2 = por %p2605_p0, %p2604_p13 }
  0x99   : > { %p2600_p12 = pneg %p2599_p11 }
  0x9b   : > { %p2607_p5 = pnand %p2606_p2, %p2600_p12 }
  0x9d   : > { %2610 = shalt.err (!%p2607_p5)
}
  0x9e   : > { %2309 = dma.hbm_to_vmem [thread:$0]  (!%p2833_p6), %s3325_s8, 512, %s383_s12, [#allocation12], %s2724_s30, %s2724_s30, %s2725_s11  }
  0x9f   : > { %s1948_s27 = sadd.s32 4294967294, %s2719_s20   ;;  %s2977_s16 = sadd.s32 1, %s2719_s20  }
  0xa0   : > { %s35_s29 = ssub.s32 %s2719_s20, %s2977_s16  ;;  %s38_s4 = sadd.s32 1, %s2715_s19 }
  0xa1   : > { %p36_p8 = scmp.eq.s32.totalorder %s35_s29, 0  ;;  %p45_p7 = scmp.ne.s32.totalorder %s2715_s19, %s2711_s18 }
  0xa2   : > { %p46_p9 = scmp.eq.s32.totalorder %s2719_s20, 0  ;;  %p51_p4 = scmp.ne.s32.totalorder %s2711_s18, %s2707_s17 }
  0xa3   : > { %s2988_s9 = scalar_select %p36_p8, %s2715_s19, %s38_s4  }
  0xa4   : > { %p2990_p1 = por %p46_p9, %p45_p7  ;;  %p3342_p3 = scmp.eq.s32.totalorder %s2817_s23, 0 }
  0xa5   : > { %p264_p10 = scmp.eq.s32.totalorder %s2817_s23, 1  ;;  %p270_p11 = scmp.eq.s32.totalorder %s1948_s27, 1 }
  0xa6   : > { %p2996_p6 = por %p3342_p3, %p51_p4  ;;  %p2324_p12 = scmp.lt.s32.totalorder %s2719_s20, 2 }
  0xa7   : > { %s399_s11 = sand.u32 1, %s2715_s19   ;;  %p3003_p13 = por %p264_p10, %p45_p7 }
  0xa8   : > { %p3007_p0 = por %p270_p11, %p51_p4  ;;  %s1957_s25 = sshll.u32 %s399_s11, 3 }
  0xa9   : > { %s3344_s12 = scalar_select %p3003_p13, 1, 0 }
  0xaa   : > { %s3345_s15 = scalar_select %p3007_p0, 1, 0 }
  0xab   : > { %s1958_s28 = sshll.u32 %s2719_s20, 7  ;;  %s403_s1 = scalar_lea.vmem [#allocation2], %s1957_s25 }
  0xac   : > { %s3015_s21 = scalar_lea.hbm %s3317_s0, %s1958_s28  ;;  %s410_s14 = sshll.u32 %s403_s1, 4  ;;  %s3017_s14 = int_to_ptr.vmem [resolvable:$true] %s410_s14 }
  0xad   : > { %p3021_p2 = pnand %p2324_p12, %p2990_p1  ;;  %s400_s29 = scalar_lea.sflag [#allocation3], %s399_s11 }
  0xae   : > { %s2611_s4 = scalar_lea.hbm %s3015_s21, 128  ;;  %s2616_s22 = scalar_lea.hbm %s3317_s0, 256 }
  0xaf   : > { %p2612_p5 = scmp.ne.s32.totalorder %s3015_s21, %s2611_s4  ;;  %p2613_p8 = pneg %p3021_p2 }
  0xb0   : > { %p2617_p4 = scmp.lt.u32.totalorder %s3015_s21, %s3317_s0  ;;  %p2618_p1 = scmp.lt.u32.totalorder %s2616_s22, %s2611_s4 }
  0xb1   : > { %p2614_p7 = pnand %p2613_p8, %p2612_p5  ;;  %p2620_p10 = scmp.lt.u32.totalorder %s2611_s4, %s3015_s21 }
  0xb2   : > { %p2619_p3 = por %p2618_p1, %p2617_p4 }
  0xb3   : > { %p2615_p9 = pneg %p2614_p7 }
  0xb4   : > { %p2621_p11 = por %p2620_p10, %p2619_p3 }
  0xb6   : > { %p2622_p12 = pnand %p2621_p11, %p2615_p9 }
  0xb8   : > { %2625 = shalt.err (!%p2622_p12)
}
  0xb9   : > { %s2626_s11 = scalar_lea.vmem %s3017_s14, 128  ;;  %s2729_s1 = smov [#allocation2]  }
  0xba   : > { %p2627_p5 = scmp.ne.s32.totalorder %s3017_s14, %s2626_s11  ;;  %s2631_s25 = sshll.u32 %s2729_s1, 4  ;;  %s2632_s25 = int_to_ptr.vmem [resolvable:$false] %s2631_s25 }
  0xbb   : > { %s2633_s28 = scalar_lea.vmem %s2632_s25, 256  ;;  %p2634_p13 = scmp.lt.s32.totalorder %s3017_s14, %s2632_s25 }
  0xbc   : > { %p2629_p7 = pnand %p2627_p5, %p2613_p8  ;;  %p2635_p4 = scmp.lt.s32.totalorder %s2633_s28, %s2626_s11 }
  0xbe   : > { %p2630_p0 = pneg %p2629_p7  ;;  %p2636_p1 = por %p2635_p4, %p2634_p13 }
  0xc0   : > { %p2637_p3 = pnand %p2636_p1, %p2630_p0 }
  0xc2   : > { %2640 = shalt.err (!%p2637_p3)
}
  0xc3   : > { %2313 = dma.hbm_to_vmem [thread:$0]  (!%p3021_p2), %s3015_s21, 128, %s3017_s14, %s400_s29  }
  0xc4   : > { %p3347_p9 = scmp.ne.s32.totalorder %s3336_s24, 0 }
  0xc5   : > { %s3053_s4 = sand.u32 (!%p3347_p9), 1, %s2711_s18  }
  0xc6   : > { %419 = sbr.rel (%p3347_p9) target bundleno = 6586 (0x19ba), region = 60  ;;  %s1960_s22 = sshll.u32 (!%p3347_p9), %s3053_s4, 3 }
  0xc7   : > { %s422_s13 = scalar_lea.sflag (!%p3347_p9), [#allocation3], %s3053_s4  ;;  %s425_s26 = scalar_lea.vmem (!%p3347_p9), [#allocation2], %s1960_s22 }
  0xcd   : > { %2686 = dma.done.wait (%p2996_p6), %s422_s13, 128  }
  0xce   : > { %2688 = vsyncadd (%p2996_p6), %s422_s13, 4294967168  ;;  %p3348_p13 = scmp.eq.s32.totalorder %s2817_s23, 0 }
  0xd0   : > { %2690 = dma.done.wait (%p3348_p13), [#allocation6], 256   ;;  %p3349_p0 = pmov %p3348_p13 }
  0xd2   : > { %2692 = vsyncadd (%p3349_p0), [#allocation6], 4294967040  ;;  %p3350_p2 = pmov %p3349_p0 }
  0xd3   : > { %p3351_p8 = pmov %p3349_p0 }
  0xd4   : > { %2694 = dma.done.wait (%p3350_p2), [#allocation9], 1024  }
  0xd5   : > { %2696 = vsyncadd (%p3351_p8), [#allocation9], 4294966272  ;;  %p3352_p10 = pmov %p3349_p0 }
  0xd6   : > { %p3353_p11 = pmov %p3349_p0 }
  0xd7   : > { %2698 = dma.done.wait (%p3352_p10), [#allocation12], 1024  }
  0xd8   : > { %2700 = vsyncadd (%p3353_p11), [#allocation12], 4294966272  ;;  %vm497_vm0 = vcmask 261120   ;;  %v496_v0 = vld [vmem:[%s425_s26] sm:$0xff]  ;;  %v2730_v13 = vmov 0.0|0.0   ;;  %v539_v22 = vld [vmem:[%s3320_s3 + $0x10] sm:$0xff]  ;;  %v800_v48 = vlaneseq }
  0xd9   : > { %v498_v1 = vsel %vm497_vm0, %v496_v0, 0.0  ;;  %2185 = vmatprep.subr.bf16.mxu0 %v2730_v13  ;;  %2191 = vmatprep.subr.bf16.mxu1 %v2730_v13  ;;  %v537_v14 = vld [vmem:[%s3320_s3] sm:$0xff]  ;;  %v538_v15 = vld [vmem:[%s3320_s3 + $0x8] sm:$0xff]  ;;  %v540_v23 = vld [vmem:[%s3320_s3 + $0x18] sm:$0xff]  ;;  %vm2731_vm1 = vmmov 0   ;;  %v2732_v31 = vmov 0.0  }
  0xda   : > { %499 = vadd.xlane.f32.xlu0 %v498_v1  ;;  %v2186_v16 = vpack.c.bf16 %v538_v15, %v537_v14  ;;  %v614_v17 = vld [vmem:[#allocation8] sm:$0xff]  ;;  %v615_v18 = vld [vmem:[#allocation8 + $0x8] sm:$0xff]  ;;  %v2189_v24 = vpack.c.bf16 %v540_v23, %v539_v22  ;;  %v616_v25 = vld [vmem:[#allocation8 + $0x10] sm:$0xff]  ;;  %2061 = vmatprep.mubr.msk.f32.mxu0 %vm2731_vm1, %v2732_v31  ;;  %v801_v49 = vshrl.u32 %v800_v48, 7  ;;  %s2733_s27 = smov 64   ;;  %s2734_s29 = smov 32  }
  0xdb   : > { %v2192_v19 = vpack.c.bf16 %v615_v18, %v614_v17  ;;  %v617_v26 = vld [vmem:[#allocation8 + $0x18] sm:$0xff]  ;;  %2072 = vmatprep.mubr.msk.f32.mxu1 %vm2731_vm1, %v2732_v31  ;;  %v533_v37 = vld [vmem:[#allocation5] sm:$0xff]  ;;  %v688_v39 = vld [vmem:[#allocation10] sm:$0xff]  ;;  %vm1563_vm2 = vcmask 1040384   ;;  %vm1565_vm3 = vcmask 1041408   ;;  %vm1567_vm4 = vcmask 1042432  }
  0xdc   : > { %2187 = vmatpush3.bf16.msra.mxu0 %v2186_v16  ;;  %v2195_v28 = vpack.c.bf16 %v617_v26, %v616_v25  ;;  %v689_v40 = vld [vmem:[#allocation10 + $0x8] sm:$0xff]  ;;  %v535_v41 = vld [vmem:[#allocation7] sm:$0xff]  ;;  %v690_v45 = vld [vmem:[#allocation10 + $0x10] sm:$0xff]  ;;  %v802_v50 = vsub.s32 0, %v801_v49  ;;  %vm1569_vm5 = vcmask 1043456   ;;  %vm1571_vm6 = vcmask 1044480  }
  0xdd   : > { %2193 = vmatpush3.bf16.msra.mxu1 %v2192_v19  ;;  %2188 = vmatprep.subr.bf16.mxu0 %v2730_v13  ;;  %v3099_v43 = vpack.c.bf16 %v689_v40, %v688_v39  ;;  %v691_v46 = vld [vmem:[#allocation10 + $0x18] sm:$0xff]  ;;  %v692_v51 = vld [vmem:[%s3323_s6] sm:$0x1]  ;;  %vm1573_vm7 = vcmask 1045504   ;;  %vm1575_vm8 = vcmask 1046528   ;;  %vm1609_vm9 = vcmask 130048  }
  0xde   : > { %2194 = vmatprep.subr.bf16.mxu1 %v2730_v13  ;;  %v3104_v47 = vpack.c.bf16 %v691_v46, %v690_v45  ;;  %v803_v54 = vrot.slane %v692_v51, %v802_v50  ;;  %s485_s11 = scalar_lea.vmem [#allocation14], %s1960_s22  ;;  %s1990_s1 = sshll.u32 %s2817_s23, 7 }
  0xdf   : > { %p3354_p12 = scmp.ne.s32.totalorder %s3344_s12, 0  ;;  %s2735_s21 = smov [#allocation14]  }
  0xe0   : > { %2190 = vmatpush3.bf16.msra.mxu0 %v2189_v24  ;;  %s2645_s22 = sshll.u32 %s2735_s21, 4  ;;  %s2646_s22 = int_to_ptr.vmem [resolvable:$false] %s2645_s22 }
  0xe1   : > { %2196 = vmatpush3.bf16.msra.mxu1 %v2195_v28  ;;  %2197 = vmatprep.subr.bf16.mxu0 %v2730_v13  ;;  %s2647_s14 = scalar_lea.vmem %s2646_s22, 256 }
  0xe2   : > { %2203 = vmatprep.subr.bf16.mxu1 %v2730_v13 }
 0x167   : > { %v500_v2 = vpop.xlane.xlu0 %499 }
 0x168   : > { %v501_v3 = vrot.slane %v500_v2, 4 }
 0x16a   : > { %v502_v4 = vadd.f32 %v501_v3, %v500_v2 }
 0x16c   : > { %v503_v5 = vrot.slane %v502_v4, 2 }
 0x16e   : > { %v504_v6 = vadd.f32 %v503_v5, %v502_v4 }
 0x170   : > { %v505_v7 = vrot.slane %v504_v6, 1 }
 0x172   : > { %v506_v8 = vadd.f32 %v505_v7, %v504_v6 }
 0x174   : > { %2257 = vpush %v506_v8 }
 0x1a5   : > { %s2258_s24 = spop %2257 }
 0x1a6   : > { %s510_s30 = smul.f32 0.00390625, %s2258_s24 }
 0x1a8   : > { %v511_v9 = vstv %s510_s30 }
 0x1a9   : > { %v512_v10 = vsub.f32 %v496_v0, %v511_v9 }
 0x1ab   : > { %v513_v11 = vmul.f32 %v512_v10, %v512_v10 }
 0x1ad   : > { %v514_v12 = vsel %vm497_vm0, %v513_v11, 0.0 }
 0x1ae   : > { %515 = vadd.xlane.f32.xlu0 %v514_v12 }
 0x23b   : > { %v516_v20 = vpop.xlane.xlu0 %515 }
 0x23c   : > { %v517_v21 = vrot.slane %v516_v20, 4 }
 0x23e   : > { %v518_v27 = vadd.f32 %v517_v21, %v516_v20 }
 0x240   : > { %v519_v29 = vrot.slane %v518_v27, 2 }
 0x242   : > { %v520_v30 = vadd.f32 %v519_v29, %v518_v27 }
 0x244   : > { %v521_v32 = vrot.slane %v520_v30, 1 }
 0x246   : > { %v522_v33 = vadd.f32 %v521_v32, %v520_v30 }
 0x248   : > { %2259 = vpush %v522_v33 }
 0x279   : > { %s2260_s13 = spop %2259 }
 0x27a   : > { %s526_s26 = smul.f32 0.00390625, %s2260_s13  ;;  %s3271_s13 = scalar_lea.hbm %s3327_s10, %s1990_s1 }
 0x27c   : > { %s527_s24 = sadd.f32 1e-05, %s526_s26  ;;  %s1794_s26 = sshll.u32 %s485_s11, 4  ;;  %s1795_s26 = int_to_ptr.vmem [resolvable:$true] %s1794_s26 }
 0x27d   : > { %p2648_p4 = scmp.lt.s32.totalorder %s1795_s26, %s2646_s22 }
 0x27e   : > { %v528_v34 = vstv %s527_s24  ;;  %s1777_s24 = scalar_lea.sflag [#allocation4], %s3053_s4 }
 0x27f   : > { %2377 = vrsqrt.f32 %v528_v34 }
 0x289   : > { %v2378_v35 = vpop.eup %2377 }
 0x28a   : > { %2261 = vpush %v2378_v35 }
 0x2bb   : > { %s2262_s30 = spop %2261 }
 0x2bc   : > { %v531_v36 = vstv %s2262_s30  ;;  %s2641_s30 = scalar_lea.vmem %s1795_s26, 128 }
 0x2bd   : > { %v532_v38 = vmul.f32 %v531_v36, %v512_v10  ;;  %p2642_p6 = scmp.ne.s32.totalorder %s1795_s26, %s2641_s30  ;;  %p2649_p1 = scmp.lt.s32.totalorder %s2647_s14, %s2641_s30 }
 0x2bf   : > { %v534_v42 = vmul.f32 %v533_v37, %v532_v38  ;;  %p2643_p5 = pnand %p2642_p6, %p3354_p12  ;;  %p2650_p3 = por %p2649_p1, %p2648_p4 }
 0x2c1   : > { %v536_v44 = vadd.f32 %v535_v41, %v534_v42  ;;  %p2644_p7 = pneg %p2643_p5 }
 0x2c3   : > { %2062 = vmatmul.mubr.msk.f32.vlgmr.msra.gmra.mrb[0].mxu0 %vm497_vm0, %v536_v44  ;;  %2073 = vmatmul.mubr.msk.f32.vlgmr.msra.gmra.mrb[0].mxu1 %vm497_vm0, %v536_v44  ;;  %p2651_p9 = pnand %p2650_p3, %p2644_p7 }
 0x2c4   : > { %2199 = vmatpush3.bf16.msra.mxu0 %v3099_v43  ;;  %2083 = vmatprep.mubr.msk.f32.mxu0 %vm2731_vm1, %v2732_v31 }
 0x2c5   : > { %2200 = vmatprep.subr.bf16.mxu0 %v2730_v13  ;;  %2205 = vmatpush3.bf16.msra.mxu1 %v3099_v43 }
 0x2c6   : > { %2206 = vmatprep.subr.bf16.mxu1 %v2730_v13  ;;  %2094 = vmatprep.mubr.msk.f32.mxu1 %vm2731_vm1, %v2732_v31 }
 0x2c8   : > { %2202 = vmatpush3.bf16.msra.mxu0 %v3104_v47 }
 0x2c9   : > { %2208 = vmatpush3.bf16.msra.mxu1 %v3104_v47  ;;  %2209 = vmatprep.subr.bf16.mxu0 %v2730_v13 }
 0x2ca   : > { %2215 = vmatprep.subr.bf16.mxu1 %v2730_v13 }
 0x2cb   : > { %2084 = vmatmul.mubr.f32.vlgmr.msra.gmra.mrb[2].mxu0 %v2732_v31 }
 0x2cc   : > { %2211 = vmatpush3.bf16.msra.mxu0 %v3099_v43  ;;  %2105 = vmatprep.mubr.msk.f32.mxu0 %vm2731_vm1, %v2732_v31 }
 0x2cd   : > { %2212 = vmatprep.subr.bf16.mxu0 %v2730_v13 }
 0x2d0   : > { %2214 = vmatpush3.bf16.msra.mxu0 %v3104_v47 }
 0x2d1   : > { %2221 = vmatprep.subr.bf16.mxu0 %v2730_v13 }
 0x396   : > { %v610_v52 = vpop.f32.mrb[0].mxu0  ;;  %v684_v53 = vpop.f32.mrb[0].mxu1 }
 0x397   : > { %v694_v55 = vrot.slane %v684_v53, 7  ;;  %v796_v56 = vrot.slane %v684_v53, 5  ;;  %v912_v57 = vrot.slane %v684_v53, 3  ;;  %v1023_v58 = vrot.slane %v684_v53, 1  ;;  %v2063_v59 = vpop.f32.mrb[1].mxu0  ;;  %v2074_v60 = vpop.f32.mrb[1].mxu1 }
 0x399   : > { %v696_v61 = vadd.f32 %v694_v55, %v610_v52  ;;  %v798_v62 = vadd.f32 %v796_v56, %v610_v52  ;;  %v914_v63 = vadd.f32 %v912_v57, %v610_v52  ;;  %v1025_v0 = vadd.f32 %v1023_v58, %v610_v52 }
 0x39b   : > { %v697_v1 = vadd.f32 %v696_v61, %v692_v51  ;;  %v3127_v2 = vadd.f32 %v914_v63, %v803_v54  ;;  %v3129_v3 = vadd.f32 %v1025_v0, %v803_v54  ;;  %v3131_v4 = vadd.f32 %v803_v54, %v696_v61 }
 0x39c   : > { %v3147_v24 = vadd.f32 %v803_v54, %v798_v62 }
 0x39e   : > { %v767_v5 = vpop.f32.mrb[2].mxu0 }
 0x39f   : > { %v771_v6 = vadd.f32 %v767_v5, %v697_v1  ;;  %v2085_v7 = vpop.f32.mrb[3].mxu0 }
 0x3a1   : > { %2379 = vtanh.f32 %v771_v6  ;;  %v1971_v9 = vmul.f32 -1.442695, %v771_v6 }
 0x3a3   : > { %2381 = vpow2.f32 %v1971_v9 }
 0x3ab   : > { %v2380_v8 = vpop.eup %2379 }
 0x3ac   : > { %781 = vrot.lane.b32.xlu1 %v2380_v8, %s2733_s27 }
 0x3ad   : > { %v2382_v10 = vpop.eup %2381 }
 0x3ae   : > { %v775_v11 = vadd.f32 1.0, %v2382_v10 }
 0x3b0   : > { %2383 = vrcp.f32 %v775_v11 }
 0x3ba   : > { %v2384_v12 = vpop.eup %2383 }
 0x3bb   : > { %v779_v16 = vmul.f32 0.0, %v2384_v12 }
 0x41e   : > { %v782_v14 = vpop.permute.xlu1 %781 }
 0x41f   : > { %v784_v15 = vmul.f32 %v2384_v12, %v782_v14 }
 0x421   : > { %786 = vrot.lane.b32.xlu1 %v784_v15, %s2734_s29 }
 0x493   : > { %v787_v17 = vpop.permute.xlu1 %786 }
 0x494   : > { %v789_v18 = vadd.f32 %v787_v17, %v779_v16 }
 0x496   : > { %2385 = vtanh.f32 %v789_v18  ;;  %v893_v36 = vrot.slane %v789_v18, 7 }
 0x4a0   : > { %v2386_v19 = vpop.eup %2385 }
 0x4a1   : > { %792 = vrot.lane.b32.xlu0 %v2386_v19, %s2733_s27 }
 0x513   : > { %v793_v20 = vpop.permute.xlu0 %792 }
 0x514   : > { %v3136_v21 = vmul.f32 %v2384_v12, %v793_v20 }
 0x516   : > { %807 = vrot.lane.b32.xlu1 %v3136_v21, %s2734_s29 }
 0x588   : > { %v808_v22 = vpop.permute.xlu1 %807 }
 0x589   : > { %2095 = vmatmul.mubr.msk.f32.vlgmr.msra.gmra.mrb[2].mxu1 %vm497_vm0, %v808_v22 }
 0x58a   : > { %2217 = vmatpush3.bf16.msra.mxu1 %v3099_v43  ;;  %2116 = vmatprep.mubr.msk.f32.mxu1 %vm2731_vm1, %v2732_v31 }
 0x58b   : > { %2218 = vmatprep.subr.bf16.mxu1 %v2730_v13 }
 0x58e   : > { %2220 = vmatpush3.bf16.msra.mxu1 %v3104_v47 }
 0x58f   : > { %2227 = vmatprep.subr.bf16.mxu1 %v2730_v13 }
 0x65c   : > { %v877_v23 = vpop.f32.mrb[2].mxu1 }
 0x65d   : > { %v882_v25 = vrot.slane %v877_v23, 7  ;;  %v2096_v26 = vpop.f32.mrb[3].mxu1 }
 0x65f   : > { %v884_v27 = vadd.f32 %v882_v25, %v3147_v24 }
 0x661   : > { %2387 = vtanh.f32 %v884_v27  ;;  %v1973_v29 = vmul.f32 -1.442695, %v884_v27 }
 0x663   : > { %2389 = vpow2.f32 %v1973_v29 }
 0x66b   : > { %v2388_v28 = vpop.eup %2387 }
 0x66c   : > { %897 = vrot.lane.b32.xlu1 %v2388_v28, %s2733_s27 }
 0x66d   : > { %v2390_v30 = vpop.eup %2389 }
 0x66e   : > { %v888_v32 = vadd.f32 1.0, %v2390_v30 }
 0x670   : > { %2391 = vrcp.f32 %v888_v32 }
 0x67a   : > { %v2392_v33 = vpop.eup %2391 }
 0x67b   : > { %v895_v37 = vmul.f32 %v2392_v33, %v893_v36 }
 0x6de   : > { %v898_v34 = vpop.permute.xlu1 %897 }
 0x6df   : > { %v900_v35 = vmul.f32 %v2392_v33, %v898_v34 }
 0x6e1   : > { %902 = vrot.lane.b32.xlu1 %v900_v35, %s2734_s29 }
 0x753   : > { %v903_v38 = vpop.permute.xlu1 %902 }
 0x754   : > { %v905_v39 = vadd.f32 %v903_v38, %v895_v37 }
 0x756   : > { %2393 = vtanh.f32 %v905_v39  ;;  %v1004_v58 = vrot.slane %v905_v39, 7 }
 0x760   : > { %v2394_v40 = vpop.eup %2393 }
 0x761   : > { %908 = vrot.lane.b32.xlu1 %v2394_v40, %s2733_s27 }
 0x7d3   : > { %v909_v41 = vpop.permute.xlu1 %908 }
 0x7d4   : > { %v3153_v42 = vmul.f32 %v2392_v33, %v909_v41 }
 0x7d6   : > { %v917_v44 = vrot.slane %v3153_v42, 1  ;;  %v1564_v1 = vsel %vm1563_vm2, %v3136_v21, %v3153_v42 }
 0x7d8   : > { %918 = vrot.lane.b32.xlu1 %v917_v44, %s2734_s29 }
 0x84a   : > { %v919_v45 = vpop.permute.xlu1 %918 }
 0x84b   : > { %2106 = vmatmul.mubr.msk.f32.vlgmr.msra.gmra.mrb[4].mxu0 %vm497_vm0, %v919_v45 }
 0x84c   : > { %2223 = vmatpush3.bf16.msra.mxu0 %v3099_v43  ;;  %2127 = vmatprep.mubr.msk.f32.mxu0 %vm2731_vm1, %v2732_v31 }
 0x84d   : > { %2224 = vmatprep.subr.bf16.mxu0 %v2730_v13 }
 0x850   : > { %2226 = vmatpush3.bf16.msra.mxu0 %v3104_v47 }
 0x851   : > { %2233 = vmatprep.subr.bf16.mxu0 %v2730_v13 }
 0x91e   : > { %v988_v46 = vpop.f32.mrb[4].mxu0 }
 0x91f   : > { %v993_v48 = vrot.slane %v988_v46, 6  ;;  %v2107_v49 = vpop.f32.mrb[5].mxu0 }
 0x921   : > { %v995_v50 = vadd.f32 %v993_v48, %v3127_v2 }
 0x923   : > { %2395 = vtanh.f32 %v995_v50  ;;  %v1975_v52 = vmul.f32 -1.442695, %v995_v50 }
 0x925   : > { %2397 = vpow2.f32 %v1975_v52 }
 0x92d   : > { %v2396_v51 = vpop.eup %2395 }
 0x92e   : > { %1008 = vrot.lane.b32.xlu1 %v2396_v51, %s2733_s27 }
 0x92f   : > { %v2398_v53 = vpop.eup %2397 }
 0x930   : > { %v999_v54 = vadd.f32 1.0, %v2398_v53 }
 0x932   : > { %2399 = vrcp.f32 %v999_v54 }
 0x93c   : > { %v2400_v55 = vpop.eup %2399 }
 0x93d   : > { %v1006_v59 = vmul.f32 %v2400_v55, %v1004_v58 }
 0x9a0   : > { %v1009_v56 = vpop.permute.xlu1 %1008 }
 0x9a1   : > { %v1011_v57 = vmul.f32 %v2400_v55, %v1009_v56 }
 0x9a3   : > { %1013 = vrot.lane.b32.xlu0 %v1011_v57, %s2734_s29 }
 0xa15   : > { %v1014_v60 = vpop.permute.xlu0 %1013 }
 0xa16   : > { %v1016_v61 = vadd.f32 %v1014_v60, %v1006_v59 }
 0xa18   : > { %2401 = vtanh.f32 %v1016_v61  ;;  %v1115_v20 = vrot.slane %v1016_v61, 7 }
 0xa22   : > { %v2402_v62 = vpop.eup %2401 }
 0xa23   : > { %1019 = vrot.lane.b32.xlu1 %v2402_v62, %s2733_s27 }
 0xa95   : > { %v1020_v63 = vpop.permute.xlu1 %1019 }
 0xa96   : > { %v3168_v0 = vmul.f32 %v2400_v55, %v1020_v63 }
 0xa98   : > { %v1566_v5 = vsel %vm1565_vm3, %v1564_v1, %v3168_v0  ;;  %v1028_v6 = vrot.slane %v3168_v0, 2 }
 0xa9a   : > { %1029 = vrot.lane.b32.xlu0 %v1028_v6, %s2734_s29 }
 0xb0c   : > { %v1030_v7 = vpop.permute.xlu0 %1029 }
 0xb0d   : > { %2117 = vmatmul.mubr.msk.f32.vlgmr.msra.gmra.mrb[4].mxu1 %vm497_vm0, %v1030_v7 }
 0xb0e   : > { %2229 = vmatpush3.bf16.msra.mxu1 %v3099_v43  ;;  %2138 = vmatprep.mubr.msk.f32.mxu1 %vm2731_vm1, %v2732_v31 }
 0xb0f   : > { %2230 = vmatprep.subr.bf16.mxu1 %v2730_v13 }
 0xb12   : > { %2232 = vmatpush3.bf16.msra.mxu1 %v3104_v47 }
 0xb13   : > { %2239 = vmatprep.subr.bf16.mxu1 %v2730_v13 }
 0xbe0   : > { %v1099_v8 = vpop.f32.mrb[4].mxu1 }
 0xbe1   : > { %v1104_v9 = vrot.slane %v1099_v8, 5  ;;  %v2118_v10 = vpop.f32.mrb[5].mxu1 }
 0xbe3   : > { %v1106_v11 = vadd.f32 %v1104_v9, %v3129_v3 }
 0xbe5   : > { %2403 = vtanh.f32 %v1106_v11  ;;  %v1977_v14 = vmul.f32 -1.442695, %v1106_v11 }
 0xbe7   : > { %2405 = vpow2.f32 %v1977_v14 }
 0xbef   : > { %v2404_v12 = vpop.eup %2403 }
 0xbf0   : > { %1119 = vrot.lane.b32.xlu1 %v2404_v12, %s2733_s27 }
 0xbf1   : > { %v2406_v15 = vpop.eup %2405 }
 0xbf2   : > { %v1110_v16 = vadd.f32 1.0, %v2406_v15 }
 0xbf4   : > { %2407 = vrcp.f32 %v1110_v16 }
 0xbfe   : > { %v2408_v17 = vpop.eup %2407 }
 0xbff   : > { %v1117_v22 = vmul.f32 %v2408_v17, %v1115_v20 }
 0xc62   : > { %v1120_v18 = vpop.permute.xlu1 %1119 }
 0xc63   : > { %v1122_v19 = vmul.f32 %v2408_v17, %v1120_v18 }
 0xc65   : > { %1124 = vrot.lane.b32.xlu0 %v1122_v19, %s2734_s29 }
 0xcd7   : > { %v1125_v23 = vpop.permute.xlu0 %1124 }
 0xcd8   : > { %v1127_v25 = vadd.f32 %v1125_v23, %v1117_v22 }
 0xcda   : > { %2409 = vtanh.f32 %v1127_v25  ;;  %v1223_v46 = vrot.slane %v1127_v25, 7 }
 0xce4   : > { %v2410_v26 = vpop.eup %2409 }
 0xce5   : > { %1130 = vrot.lane.b32.xlu1 %v2410_v26, %s2733_s27 }
 0xd57   : > { %v1131_v27 = vpop.permute.xlu1 %1130 }
 0xd58   : > { %v3188_v28 = vmul.f32 %v2408_v17, %v1131_v27 }
 0xd5a   : > { %v1568_v29 = vsel %vm1567_vm4, %v1566_v5, %v3188_v28  ;;  %v1136_v30 = vrot.slane %v3188_v28, 3 }
 0xd5c   : > { %1137 = vrot.lane.b32.xlu0 %v1136_v30, %s2734_s29 }
 0xdce   : > { %v1138_v32 = vpop.permute.xlu0 %1137 }
 0xdcf   : > { %2128 = vmatmul.mubr.msk.f32.vlgmr.msra.gmra.mrb[6].mxu0 %vm497_vm0, %v1138_v32 }
 0xdd0   : > { %2235 = vmatpush3.bf16.msra.mxu0 %v3099_v43  ;;  %2149 = vmatprep.mubr.msk.f32.mxu0 %vm2731_vm1, %v2732_v31 }
 0xdd1   : > { %2236 = vmatprep.subr.bf16.mxu0 %v2730_v13 }
 0xdd4   : > { %2238 = vmatpush3.bf16.msra.mxu0 %v3104_v47 }
 0xdd5   : > { %2245 = vmatprep.subr.bf16.mxu0 %v2730_v13 }
 0xea2   : > { %v1207_v33 = vpop.f32.mrb[6].mxu0 }
 0xea3   : > { %v1212_v34 = vrot.slane %v1207_v33, 4  ;;  %v2129_v35 = vpop.f32.mrb[7].mxu0 }
 0xea5   : > { %v1214_v36 = vadd.f32 %v1212_v34, %v3131_v4 }
 0xea7   : > { %2411 = vtanh.f32 %v1214_v36  ;;  %v1979_v38 = vmul.f32 -1.442695, %v1214_v36 }
 0xea9   : > { %2413 = vpow2.f32 %v1979_v38 }
 0xeb1   : > { %v2412_v37 = vpop.eup %2411 }
 0xeb2   : > { %1227 = vrot.lane.b32.xlu1 %v2412_v37, %s2733_s27 }
 0xeb3   : > { %v2414_v39 = vpop.eup %2413 }
 0xeb4   : > { %v1218_v40 = vadd.f32 1.0, %v2414_v39 }
 0xeb6   : > { %2415 = vrcp.f32 %v1218_v40 }
 0xec0   : > { %v2416_v41 = vpop.eup %2415 }
 0xec1   : > { %v1225_v48 = vmul.f32 %v2416_v41, %v1223_v46 }
 0xf24   : > { %v1228_v44 = vpop.permute.xlu1 %1227 }
 0xf25   : > { %v1230_v45 = vmul.f32 %v2416_v41, %v1228_v44 }
 0xf27   : > { %1232 = vrot.lane.b32.xlu0 %v1230_v45, %s2734_s29 }
 0xf99   : > { %v1233_v49 = vpop.permute.xlu0 %1232 }
 0xf9a   : > { %v1235_v50 = vadd.f32 %v1233_v49, %v1225_v48 }
 0xf9c   : > { %2417 = vtanh.f32 %v1235_v50 }
 0xfa6   : > { %v2418_v4 = vpop.eup %2417 }
 0xfa7   : > { %1238 = vrot.lane.b32.xlu1 %v2418_v4, %s2733_s27 }
0x1019   : > { %v1239_v51 = vpop.permute.xlu1 %1238 }
0x101a   : > { %v3205_v52 = vmul.f32 %v2416_v41, %v1239_v51 }
0x101c   : > { %v1570_v53 = vsel %vm1569_vm5, %v1568_v29, %v3205_v52  ;;  %v1243_v54 = vrot.slane %v3205_v52, 4 }
0x101e   : > { %1244 = vrot.lane.b32.xlu0 %v1243_v54, %s2734_s29 }
0x1090   : > { %v1245_v55 = vpop.permute.xlu0 %1244 }
0x1091   : > { %2139 = vmatmul.mubr.msk.f32.vlgmr.msra.gmra.mrb[6].mxu1 %vm497_vm0, %v1245_v55 }
0x1092   : > { %2241 = vmatpush3.bf16.msra.mxu1 %v3099_v43  ;;  %2160 = vmatprep.mubr.msk.f32.mxu1 %vm2731_vm1, %v2732_v31 }
0x1093   : > { %2242 = vmatprep.subr.bf16.mxu1 %v2730_v13 }
0x1096   : > { %2244 = vmatpush3.bf16.msra.mxu1 %v3104_v47  ;;  %v1330_v47 = vrot.slane %v1235_v50, 7 }
0x1097   : > { %2251 = vmatprep.subr.bf16.mxu1 %v2730_v13 }
0x1164   : > { %v1314_v56 = vpop.f32.mrb[6].mxu1 }
0x1165   : > { %v1319_v57 = vrot.slane %v1314_v56, 3  ;;  %v2140_v58 = vpop.f32.mrb[7].mxu1  ;;  %v1611_v56 = vld [vmem:[#allocation11] sm:$0xff] }
0x1166   : > { %v1615_v58 = vld [vmem:[#allocation13] sm:$0xff] }
0x1167   : > { %v1321_v59 = vadd.f32 %v1319_v57, %v3147_v24  ;;  %v1612_v57 = vld [vmem:[#allocation11 + $0x8] sm:$0xff] }
0x1169   : > { %2419 = vtanh.f32 %v1321_v59  ;;  %v1981_v61 = vmul.f32 -1.442695, %v1321_v59  ;;  %v2252_v59 = vpack.c.bf16 %v1612_v57, %v1611_v56 }
0x116b   : > { %2421 = vpow2.f32 %v1981_v61  ;;  %v1613_v61 = vld [vmem:[#allocation11 + $0x10] sm:$0xff] }
0x1173   : > { %v2420_v60 = vpop.eup %2419 }
0x1174   : > { %1334 = vrot.lane.b32.xlu1 %v2420_v60, %s2733_s27  ;;  %v1616_v60 = vld [vmem:[#allocation13 + $0x8] sm:$0xff] }
0x1175   : > { %v2422_v43 = vpop.eup %2421 }
0x1176   : > { %v1325_v62 = vadd.f32 1.0, %v2422_v43  ;;  %v1614_v43 = vld [vmem:[#allocation11 + $0x18] sm:$0xff] }
0x1178   : > { %2423 = vrcp.f32 %v1325_v62  ;;  %v2246_v62 = vpack.c.bf16 %v1616_v60, %v1615_v58 }
0x1182   : > { %v2424_v63 = vpop.eup %2423 }
0x1183   : > { %v1332_v6 = vmul.f32 %v2424_v63, %v1330_v47 }
0x11e6   : > { %v1335_v1 = vpop.permute.xlu1 %1334 }
0x11e7   : > { %v1337_v5 = vmul.f32 %v2424_v63, %v1335_v1  ;;  %v1617_v1 = vld [vmem:[#allocation13 + $0x10] sm:$0xff] }
0x11e9   : > { %1339 = vrot.lane.b32.xlu0 %v1337_v5, %s2734_s29  ;;  %v1618_v5 = vld [vmem:[#allocation13 + $0x18] sm:$0xff] }
0x11ea   : > { %v2249_v47 = vpack.c.bf16 %v1618_v5, %v1617_v1 }
0x125b   : > { %v1340_v7 = vpop.permute.xlu0 %1339 }
0x125c   : > { %v1342_v8 = vadd.f32 %v1340_v7, %v1332_v6 }
0x125e   : > { %2425 = vtanh.f32 %v1342_v8  ;;  %v1437_v29 = vrot.slane %v1342_v8, 7 }
0x1268   : > { %v2426_v24 = vpop.eup %2425 }
0x1269   : > { %1345 = vrot.lane.b32.xlu1 %v2426_v24, %s2733_s27 }
0x12db   : > { %v1346_v9 = vpop.permute.xlu1 %1345 }
0x12dc   : > { %v3222_v10 = vmul.f32 %v2424_v63, %v1346_v9  ;;  %v2255_v63 = vpack.c.bf16 %v1614_v43, %v1613_v61 }
0x12de   : > { %v1572_v11 = vsel %vm1571_vm6, %v1570_v53, %v3222_v10  ;;  %v1350_v12 = vrot.slane %v3222_v10, 5 }
0x12e0   : > { %1351 = vrot.lane.b32.xlu0 %v1350_v12, %s2734_s29  ;;  %v1584_v12 = vrot.slane %v3205_v52, 1 }
0x1352   : > { %v1352_v14 = vpop.permute.xlu0 %1351 }
0x1353   : > { %2150 = vmatmul.mubr.msk.f32.vlgmr.msra.gmra.mrb[8].mxu0 %vm497_vm0, %v1352_v14  ;;  %v1586_v14 = vrot.slane %v3188_v28, 7 }
0x1354   : > { %2171 = vmatprep.mubr.msk.f32.mxu0 %vm2731_vm1, %v2732_v31  ;;  %2247 = vmatpush3.bf16.msra.mxu0 %v2246_v62 }
0x1355   : > { %2248 = vmatprep.subr.bf16.mxu0 %v2730_v13 }
0x1358   : > { %2250 = vmatpush3.bf16.msra.mxu0 %v2249_v47 }
0x1426   : > { %v1421_v15 = vpop.f32.mrb[8].mxu0 }
0x1427   : > { %v1426_v16 = vrot.slane %v1421_v15, 2  ;;  %v2151_v17 = vpop.f32.mrb[9].mxu0 }
0x1429   : > { %v1428_v18 = vadd.f32 %v1426_v16, %v3127_v2  ;;  %v1588_v16 = vrot.slane %v3168_v0, 5 }
0x142b   : > { %2427 = vtanh.f32 %v1428_v18  ;;  %v1983_v20 = vmul.f32 -1.442695, %v1428_v18  ;;  %v1590_v18 = vrot.slane %v3153_v42, 3 }
0x142d   : > { %2429 = vpow2.f32 %v1983_v20 }
0x1435   : > { %v2428_v19 = vpop.eup %2427 }
0x1436   : > { %1441 = vrot.lane.b32.xlu1 %v2428_v19, %s2733_s27  ;;  %v1592_v19 = vrot.slane %v3136_v21, 1 }
0x1437   : > { %v2430_v22 = vpop.eup %2429 }
0x1438   : > { %v1432_v23 = vadd.f32 1.0, %v2430_v22 }
0x143a   : > { %2431 = vrcp.f32 %v1432_v23 }
0x1444   : > { %v2432_v25 = vpop.eup %2431 }
0x1445   : > { %v1439_v30 = vmul.f32 %v2432_v25, %v1437_v29 }
0x14a8   : > { %v1442_v26 = vpop.permute.xlu1 %1441 }
0x14a9   : > { %v1444_v27 = vmul.f32 %v2432_v25, %v1442_v26 }
0x14ab   : > { %1446 = vrot.lane.b32.xlu0 %v1444_v27, %s2734_s29 }
0x151d   : > { %v1447_v32 = vpop.permute.xlu0 %1446 }
0x151e   : > { %v1449_v33 = vadd.f32 %v1447_v32, %v1439_v30 }
0x1520   : > { %2433 = vtanh.f32 %v1449_v33 }
0x152a   : > { %v2434_v2 = vpop.eup %2433 }
0x152b   : > { %1452 = vrot.lane.b32.xlu1 %v2434_v2, %s2733_s27 }
0x159d   : > { %v1453_v34 = vpop.permute.xlu1 %1452 }
0x159e   : > { %v1455_v35 = vmul.f32 %v2432_v25, %v1453_v34 }
0x15a0   : > { %v1457_v36 = vrot.slane %v1455_v35, 6  ;;  %v1574_v37 = vsel %vm1573_vm7, %v1572_v11, %v1455_v35  ;;  %v1580_v8 = vrot.slane %v1455_v35, 5  ;;  %v1582_v11 = vrot.slane %v3222_v10, 3 }
0x15a2   : > { %1458 = vrot.lane.b32.xlu0 %v1457_v36, %s2734_s29 }
0x1614   : > { %v1459_v38 = vpop.permute.xlu0 %1458 }
0x1615   : > { %2161 = vmatmul.mubr.msk.f32.vlgmr.msra.gmra.mrb[8].mxu1 %vm497_vm0, %v1459_v38 }
0x1616   : > { %2182 = vmatprep.mubr.msk.f32.mxu1 %vm2731_vm1, %v2732_v31  ;;  %v1544_v31 = vrot.slane %v1449_v33, 7  ;;  %2253 = vmatpush3.bf16.msra.mxu1 %v2252_v59 }
0x1617   : > { %2254 = vmatprep.subr.bf16.mxu1 %v2730_v13 }
0x161a   : > { %2256 = vmatpush3.bf16.msra.mxu1 %v2255_v63 }
0x16e8   : > { %v1528_v39 = vpop.f32.mrb[8].mxu1 }
0x16e9   : > { %v1533_v40 = vrot.slane %v1528_v39, 1  ;;  %v2162_v41 = vpop.f32.mrb[9].mxu1 }
0x16eb   : > { %v1535_v44 = vadd.f32 %v1533_v40, %v3129_v3 }
0x16ed   : > { %2435 = vtanh.f32 %v1535_v44  ;;  %v1985_v46 = vmul.f32 -1.442695, %v1535_v44 }
0x16ef   : > { %2437 = vpow2.f32 %v1985_v46 }
0x16f7   : > { %v2436_v45 = vpop.eup %2435 }
0x16f8   : > { %1548 = vrot.lane.b32.xlu1 %v2436_v45, %s2733_s27 }
0x16f9   : > { %v2438_v48 = vpop.eup %2437 }
0x16fa   : > { %v1539_v49 = vadd.f32 1.0, %v2438_v48 }
0x16fc   : > { %2439 = vrcp.f32 %v1539_v49 }
0x1706   : > { %v2440_v50 = vpop.eup %2439 }
0x1707   : > { %v1546_v53 = vmul.f32 %v2440_v50, %v1544_v31 }
0x176a   : > { %v1549_v4 = vpop.permute.xlu1 %1548 }
0x176b   : > { %v1551_v51 = vmul.f32 %v2440_v50, %v1549_v4 }
0x176d   : > { %1553 = vrot.lane.b32.xlu0 %v1551_v51, %s2734_s29 }
0x17df   : > { %v1554_v54 = vpop.permute.xlu0 %1553 }
0x17e0   : > { %v1556_v55 = vadd.f32 %v1554_v54, %v1546_v53 }
0x17e2   : > { %2441 = vtanh.f32 %v1556_v55 }
0x17ec   : > { %v2442_v3 = vpop.eup %2441 }
0x17ed   : > { %1559 = vrot.lane.b32.xlu1 %v2442_v3, %s2733_s27 }
0x185f   : > { %v1560_v6 = vpop.permute.xlu1 %1559 }
0x1860   : > { %v1562_v7 = vmul.f32 %v2440_v50, %v1560_v6 }
0x1862   : > { %v1578_v24 = vrot.slane %v1562_v7, 7  ;;  %v1576_v9 = vsel %vm1575_vm8, %v1574_v37, %v1562_v7 }
0x1863   : > { %1602 = vrot.lane.b32.xlu0 %v1576_v9, %s2734_s29 }
0x1864   : > { %v1594_v13 = vsel %vm1563_vm2, %v1578_v24, %v1580_v8 }
0x1865   : > { %v1595_v15 = vsel %vm1565_vm3, %v1594_v13, %v1582_v11 }
0x1866   : > { %v1596_v17 = vsel %vm1567_vm4, %v1595_v15, %v1584_v12 }
0x1867   : > { %v1597_v10 = vsel %vm1569_vm5, %v1596_v17, %v1586_v14 }
0x1868   : > { %v1598_v52 = vsel %vm1571_vm6, %v1597_v10, %v1588_v16 }
0x1869   : > { %v1599_v20 = vsel %vm1573_vm7, %v1598_v52, %v1590_v18 }
0x186a   : > { %v1600_v28 = vsel %vm1575_vm8, %v1599_v20, %v1592_v19 }
0x186b   : > { %1606 = vrot.lane.b32.xlu1 %v1600_v28, %s2734_s29 }
0x18d5   : > { %v1603_v0 = vpop.permute.xlu0 %1602 }
0x18dd   : > { %v1607_v22 = vpop.permute.xlu1 %1606 }
0x18de   : > { %v1610_v23 = vsel %vm1609_vm9, %v1603_v0, %v1607_v22 }
0x18df   : > { %v1620_v42 = vrot.slane %v1610_v23, 1  ;;  %2183 = vmatmul.mubr.msk.f32.vlgmr.msra.gmra.mrb[10].mxu1 %vm497_vm0, %v1610_v23  ;;  %1773 = vst.msk [vmem:[%s485_s11] sm:$0xff] %vm497_vm0, %v1610_v23 }
0x18e1   : > { %2172 = vmatmul.mubr.msk.f32.vlgmr.msra.gmra.mrb[10].mxu0 %vm497_vm0, %v1620_v42 }
0x18e2   : > { %2654 = shalt.err (!%p2651_p9)
}
0x18e3   : > { %s2655_s4 = scalar_lea.hbm %s3271_s13, 128  ;;  %s2659_s11 = scalar_lea.hbm %s3327_s10, 256 }
0x18e4   : > { %p2656_p13 = scmp.ne.s32.totalorder %s3271_s13, %s2655_s4  ;;  %p2660_p8 = scmp.lt.u32.totalorder %s3271_s13, %s3327_s10 }
0x18e5   : > { %p2661_p10 = scmp.lt.u32.totalorder %s2659_s11, %s2655_s4  ;;  %p2663_p6 = scmp.lt.u32.totalorder %s2655_s4, %s3271_s13 }
0x18e6   : > { %p2657_p0 = pnand %p2656_p13, %p3354_p12 }
0x18e7   : > { %p2662_p11 = por %p2661_p10, %p2660_p8 }
0x18e8   : > { %p2658_p2 = pneg %p2657_p0 }
0x18e9   : > { %p2664_p5 = por %p2663_p6, %p2662_p11 }
0x18eb   : > { %p2665_p7 = pnand %p2664_p5, %p2658_p2 }
0x18ed   : > { %2668 = shalt.err (!%p2665_p7)
}
0x18ee   : > { %2289 = dma.vmem_to_hbm [thread:$0]  (%p3354_p12), %s1795_s26, 128, %s3271_s13, %s1777_s24   ;;  %vm1774_vm10 = vcmask 260096  }
0x18ef   : > { %p492_p4 = scmp.lt.s32.totalorder %s2817_s23, 1  ;;  %s3355_s22 = sld [smem:[#allocation22_spill]] }
0x18f0   : > { %s3356_s27 = sld [smem:[#allocation23_spill]] }
0x18f1   : > { %s3364_s23 = smov (!%p492_p4, %s2817_s23), 1 }
0x18f2   : > { %s1968_s28 = sshll.u32 %s3364_s23, 3 }
0x18f5   : > { %v1988_v27 = vld [vmem:[%s3355_s22] ss:$0 sm:$0xff] }
0x18f6   : > { %s495_s12 = scalar_lea.vmem %s3356_s27, %s1968_s28 }
0x19b2   : > { %v1761_v21 = vpop.f32.mrb[10].mxu1 }
0x19b3   : > { %v2184_v25 = vpop.f32.mrb[11].mxu1 }
0x19b4   : > { %v1689_v26 = vpop.f32.mrb[10].mxu0 }
0x19b5   : > { %v1762_v29 = vadd.f32 %v1761_v21, %v1689_v26  ;;  %v2173_v30 = vpop.f32.mrb[11].mxu0 }
0x19b7   : > { %v1772_v32 = vadd.f32 %v1988_v27, %v1762_v29 }
0x19b9   : > { %1775 = vst.msk [vmem:[%s495_s12] sm:$0x7f] %vm1774_vm10, %v1772_v32 }
0x19ba PF: > { %s1809_s13 = sand.u32 1, %s2707_s17   ;;  %p3357_p12 = scmp.ne.s32.totalorder %s3345_s15, 0 }
0x19bb   : > { %p3358_p1 = scmp.ge.s32.totalorder %s2719_s20, 2  ;;  %s1810_s23 = scalar_lea.sflag [#allocation4], %s1809_s13 }
0x19bd   : > { %p2315_p3 = pnand %p3358_p1, %p3357_p12 }
0x19bf   : > { %2702 = dma.done.wait (!%p2315_p3), %s1810_s23, 128  }
0x19c0   : > { %2704 = vsyncadd (!%p2315_p3), %s1810_s23, 4294967168  ;;  %p28_p9 = scmp.ge.s32.totalorder %s2977_s16, 4   ;;  %s3359_s17 = smov %s2711_s18 }
0x19c1   : > { %s3360_s18 = smov %s2715_s19  ;;  %s3361_s19 = smov %s2988_s9 }
0x19c2   : > { %s3362_s20 = smov %s2977_s16  ;;  %30 = sbr.rel (!%p28_p9) target bundleno = 13 (0xd), region = 141 }
0x19c9   :  { %1822 = vsyncpa [#allocation3], 1 }
0x19ca   :  { %1824 = vsyncpa [#allocation3 + $0x1], 1 }
0x19cb   :  { %1825 = vsyncpa [#allocation6], 1 }
0x19cc   :  { %1826 = vsyncpa [#allocation9], 1 }
0x19cd   :  { %1827 = vsyncpa [#allocation12], 1 }
0x19ce   :  { %1828 = vsyncpa [#allocation4], 1 }
0x19cf   :  { %1830 = vsyncpa [#allocation4 + $0x1], 1 }

</bundles_post_ra>
